<compile_context>
chip_gen: v7x
topology: tpu7x:2x2x1
jax: 0.10.0
libtpu: 0.0.40
codegen_flags: <defaults>
</compile_context>

<pallas_src>
import functools

import numpy as np
import jax
import jax.numpy as jnp
from jax import lax
from jax.experimental import pallas as pl
from jax.experimental.pallas import tpu as pltpu


# ----------------------------------------------------------------------------
# Hardware-aware tile selection helpers
# ----------------------------------------------------------------------------
def _vmem_capacity_bytes(default=64 * 1024 * 1024):
    try:
        info = pltpu.get_tpu_info()
        cap = getattr(info, "vmem_capacity_bytes", None)
        if cap:
            return int(cap)
    except Exception:
        pass
    return default  # conservative (v7x-sized) fallback


def _vmem_limit_bytes():
    vmem = _vmem_capacity_bytes()
    # ~52-56 MiB on v7x (64 MiB VMEM), ~100 MiB on v5e/v6e (128 MiB VMEM).
    return int(min(vmem * 0.85, 100 * 1024 * 1024))


def _select_block_q(n_keys, out_bytes):
    """Query-tile rows for the full-resolution kernel (VMEM-budget driven)."""
    vmem = _vmem_capacity_bytes()
    budget = vmem // 2                       # headroom for temps + compiler scratch
    # per query row: 3 double-buffered outputs + ~6 live f32 (TQ,N) temps.
    per_row = n_keys * (3 * out_bytes * 2 + 6 * 4)
    tq = budget // max(per_row, 1)
    tq = max(128, min(512, (tq // 128) * 128))   # multiple of 128 (=> of 16 for bf16)
    if tq >= n_keys:
        return n_keys                            # single full-dim block
    return tq


def _select_block_g(nw):
    """Window-group lane tile: multiple of 128 with several grid steps if possible."""
    if nw <= 256:
        return nw, nw                            # single full-dim block
    g = ((nw // 8) // 128) * 128                 # aim for >= ~8 pipelined steps
    g = max(128, min(1024, g))
    nw_pad = ((nw + g - 1) // g) * g
    return g, nw_pad


# ----------------------------------------------------------------------------
# In-kernel math: direct minimax arccos (VPU + one EUP sqrt per call)
# ----------------------------------------------------------------------------
def _acos_fast(x):
    """arccos(x), x in [-1,1]; A&S 4.4.45 minimax, ~7e-5 rad max error."""
    ax = jnp.abs(x)
    p = 1.5707288 + ax * (-0.2121144 + ax * (0.0742610 + ax * (-0.0187293)))
    r = jnp.sqrt(jnp.maximum(1.0 - ax, 0.0)) * p
    return jnp.where(x >= 0.0, r, np.pi - r)


# ----------------------------------------------------------------------------
# Full-resolution geometric structure embedding kernel (row-tiled queries)
# ----------------------------------------------------------------------------
def _geo_embed_kernel(pq_ref, nq_ref, pkT_ref, nkT_ref, kstat_ref,
                      d_ref, seta_ref, amap_ref, *, inv_sigma_d):
    # pq/nq: (TQ,3) query block; pkT/nkT: (3,N) full key cloud (transposed).
    # kstat: (3,N) hoisted key stats rows = [|p_k|^2, |n_k|, n_k.p_k].
    # outputs: (TQ,N) row blocks of the three maps (bf16 stores, f32 math).
    pq = pq_ref[...]
    nq = nq_ref[...]
    pkT = pkT_ref[...]
    nkT = nkT_ref[...]
    kstat = kstat_ref[...]
    pk_sq = kstat[0:1, :]          # (1, N)
    nk_norm = kstat[1:2, :]        # (1, N)
    nk_pk = kstat[2:3, :]          # (1, N)

    # bf16 MXU operands, f32 accumulation (K=3 contraction).
    pq_b = pq.astype(jnp.bfloat16)
    nq_b = nq.astype(jnp.bfloat16)
    pkT_b = pkT.astype(jnp.bfloat16)
    nkT_b = nkT.astype(jnp.bfloat16)
    dims = (((1,), (0,)), ((), ()))   # (TQ,3) @ (3,N) -> (TQ,N)

    # ---- d_indices = sqrt(pairwise_distance) / sigma_d ----------------------
    ppT = lax.dot_general(pq_b, pkT_b, dims, preferred_element_type=jnp.float32)
    pq_sq = jnp.sum(pq * pq, axis=1, keepdims=True)            # (TQ, 1)
    d2 = jnp.maximum(pq_sq + pk_sq - 2.0 * ppT, 0.0)
    dist = jnp.sqrt(d2)
    d_ref[...] = (dist * inv_sigma_d).astype(d_ref.dtype)

    # ---- seta = comput_angle(normals) ---------------------------------------
    nnT = lax.dot_general(nq_b, nkT_b, dims, preferred_element_type=jnp.float32)
    nq_norm = jnp.sqrt(jnp.sum(nq * nq, axis=1, keepdims=True))      # (TQ, 1)
    inv_nq = pl.reciprocal(jnp.maximum(nq_norm, 1e-30), approx=True)  # (TQ, 1)
    inv_nk = pl.reciprocal(jnp.maximum(nk_norm, 1e-30), approx=True)  # (1, N)
    cosn = jnp.where((nq_norm > 0.0) & (nk_norm > 0.0),
                     nnT * inv_nq * inv_nk, 0.0)                      # NaN(0/0)->0
    seta_ref[...] = _acos_fast(jnp.clip(cosn, -1.0, 1.0)).astype(seta_ref.dtype)

    # ---- angle_map = pairwise_angle_distance(points, normals) ---------------
    # rad[i,j] = acos( n_i.(p_j - p_i) / (|n_i| * dist) ),  rad[j,i] symmetric form.
    inv_dist = pl.reciprocal(dist + 1e-6, approx=True)                # (TQ, N)
    nq_pk = lax.dot_general(nq_b, pkT_b, dims, preferred_element_type=jnp.float32)
    nq_pq = jnp.sum(nq * pq, axis=1, keepdims=True)                   # (TQ, 1)
    cos_qk = (nq_pk - nq_pq) * (inv_nq * inv_dist)
    rad_qk = _acos_fast(jnp.clip(cos_qk, -1.0, 1.0))
    pq_nk = lax.dot_general(pq_b, nkT_b, dims, preferred_element_type=jnp.float32)
    cos_kq = (pq_nk - nk_pk) * (inv_nk * inv_dist)
    rad_kq = _acos_fast(jnp.clip(cos_kq, -1.0, 1.0))
    amap_ref[...] = jnp.abs(rad_qk - rad_kq).astype(amap_ref.dtype)


def geometric_structure_embedding(points, normals, sigma_d,
                                  out_dtype=jnp.bfloat16):
    """points, normals: (B,N,3) -> tuple of (B,N,N) maps: (d/sigma_d, seta, angle_map)."""
    points = points.astype(jnp.float32)
    normals = normals.astype(jnp.float32)
    B, N, _ = points.shape
    points_t = jnp.swapaxes(points, 1, 2)       # (B, 3, N) key-side layout
    normals_t = jnp.swapaxes(normals, 1, 2)
    # Hoisted per-key row statistics (computed once per batch, not per q-tile).
    pk_sq = jnp.sum(points * points, axis=2)                # (B, N)
    nk_norm = jnp.sqrt(jnp.sum(normals * normals, axis=2))  # (B, N)
    nk_pk = jnp.sum(normals * points, axis=2)               # (B, N)
    kstats = jnp.stack([pk_sq, nk_norm, nk_pk], axis=1)     # (B, 3, N)

    out_bytes = jnp.dtype(out_dtype).itemsize
    tq = _select_block_q(N, out_bytes)
    grid = (B, pl.cdiv(N, tq))
    kernel = functools.partial(_geo_embed_kernel, inv_sigma_d=1.0 / float(sigma_d))
    out_sds = jax.ShapeDtypeStruct((B, N, N), out_dtype)
    q_spec = pl.BlockSpec((None, tq, 3), lambda b, q: (b, q, 0))
    k_spec = pl.BlockSpec((None, 3, N), lambda b, q: (b, 0, 0))
    out_spec = pl.BlockSpec((None, tq, N), lambda b, q: (b, q, 0))
    d_ind, seta, amap = pl.pallas_call(
        kernel,
        out_shape=(out_sds, out_sds, out_sds),
        grid=grid,
        in_specs=[q_spec, q_spec, k_spec, k_spec, k_spec],
        out_specs=(out_spec, out_spec, out_spec),
        compiler_params=pltpu.CompilerParams(
            dimension_semantics=("parallel", "parallel"),
            vmem_limit_bytes=_vmem_limit_bytes()),
    )(points, normals, points_t, normals_t, kstats)
    # channel order matches torch cat: [d_embeddings, seta, angle_map]
    return d_ind, seta, amap


# ----------------------------------------------------------------------------
# Windowed embedding kernel: window index G on the LANE axis, W on sublanes.
# ----------------------------------------------------------------------------
def _geo_embed_window_kernel(px_ref, py_ref, pz_ref, nx_ref, ny_ref, nz_ref,
                             d_ref, seta_ref, amap_ref, *, inv_sigma_d):
    # inputs: (W, G) coordinate planes; outputs: (W, W, G) lane-dense maps.
    px, py, pz = px_ref[...], py_ref[...], pz_ref[...]
    nx, ny, nz = nx_ref[...], ny_ref[...], nz_ref[...]

    def outer(ax, ay, az, bx, by, bz):
        # out[i, j, g] = a_i[g] . b_j[g]   (vectorized over windows g on lanes)
        return (ax[:, None, :] * bx[None, :, :]
                + ay[:, None, :] * by[None, :, :]
                + az[:, None, :] * bz[None, :, :])

    # ---- distance map --------------------------------------------------------
    pp = outer(px, py, pz, px, py, pz)
    p_sq = px * px + py * py + pz * pz                      # (W, G)
    d2 = jnp.maximum(p_sq[:, None, :] + p_sq[None, :, :] - 2.0 * pp, 0.0)
    dist = jnp.sqrt(d2)
    d_ref[...] = (dist * inv_sigma_d).astype(d_ref.dtype)

    # ---- normal-vs-normal angle ---------------------------------------------
    nn_ = outer(nx, ny, nz, nx, ny, nz)
    n_norm = jnp.sqrt(nx * nx + ny * ny + nz * nz)          # (W, G)
    inv_n = pl.reciprocal(jnp.maximum(n_norm, 1e-30), approx=True)
    cosn = jnp.where((n_norm[:, None, :] > 0.0) & (n_norm[None, :, :] > 0.0),
                     nn_ * inv_n[:, None, :] * inv_n[None, :, :], 0.0)
    seta_ref[...] = _acos_fast(jnp.clip(cosn, -1.0, 1.0)).astype(seta_ref.dtype)

    # ---- point/normal angular distance --------------------------------------
    inv_dist = pl.reciprocal(dist + 1e-6, approx=True)      # (W, W, G)
    np_cross = outer(nx, ny, nz, px, py, pz)                # n_i . p_j
    pn_cross = outer(px, py, pz, nx, ny, nz)                # p_i . n_j
    np_self = nx * px + ny * py + nz * pz                   # (W, G)  n_i . p_i
    cos_ij = (np_cross - np_self[:, None, :]) * inv_n[:, None, :] * inv_dist
    cos_ji = (pn_cross - np_self[None, :, :]) * inv_n[None, :, :] * inv_dist
    rad_ij = _acos_fast(jnp.clip(cos_ij, -1.0, 1.0))
    rad_ji = _acos_fast(jnp.clip(cos_ji, -1.0, 1.0))
    amap_ref[...] = jnp.abs(rad_ij - rad_ji).astype(amap_ref.dtype)


def geometric_structure_embedding_windows(points_w, normals_w, sigma_d,
                                           out_dtype=jnp.bfloat16):
    """points_w, normals_w: (NW, W, 3) windows -> tuple of (NW, W, W) maps."""
    points_w = points_w.astype(jnp.float32)
    normals_w = normals_w.astype(jnp.float32)
    NW, W, _ = points_w.shape
    g, nw_pad = _select_block_g(NW)
    if nw_pad != NW:
        pad = nw_pad - NW
        points_w = jnp.concatenate(
            [points_w, jnp.zeros((pad, W, 3), jnp.float32)], axis=0)
        normals_w = jnp.concatenate(
            [normals_w, jnp.zeros((pad, W, 3), jnp.float32)], axis=0)

    # (NW_pad, W, 3) -> six (W, NW_pad) coordinate planes (window index on lanes).
    pT = jnp.transpose(points_w, (1, 2, 0))    # (W, 3, NW_pad)
    nT = jnp.transpose(normals_w, (1, 2, 0))
    planes = (pT[:, 0, :], pT[:, 1, :], pT[:, 2, :],
              nT[:, 0, :], nT[:, 1, :], nT[:, 2, :])

    grid = (nw_pad // g,)
    kernel = functools.partial(_geo_embed_window_kernel,
                               inv_sigma_d=1.0 / float(sigma_d))
    out_sds = jax.ShapeDtypeStruct((W, W, nw_pad), out_dtype)
    in_spec = pl.BlockSpec((W, g), lambda i: (0, i))
    out_spec = pl.BlockSpec((W, W, g), lambda i: (0, 0, i))
    vmem = _vmem_capacity_bytes()
    d, seta, amap = pl.pallas_call(
        kernel,
        out_shape=(out_sds, out_sds, out_sds),
        grid=grid,
        in_specs=[in_spec] * 6,
        out_specs=(out_spec, out_spec, out_spec),
        compiler_params=pltpu.CompilerParams(
            dimension_semantics=("parallel",),
            vmem_limit_bytes=int(min(vmem * 0.6, 64 * 1024 * 1024))),
    )(*planes)

    def relayout(a):   # (W, W, NW_pad) -> (NW, W, W); pure layout plumbing in XLA
        return jnp.transpose(a, (2, 0, 1))[:NW]

    return relayout(d), relayout(seta), relayout(amap)


# ----------------------------------------------------------------------------
# Fused in_proj -> (identity transformer) -> out_proj kernel, row tiled.
# ----------------------------------------------------------------------------
def _fused_proj_kernel(x_ref, w1_ref, b1_ref, w2_ref, b2_ref, o_ref):
    h = jnp.dot(x_ref[...], w1_ref[...],
                preferred_element_type=jnp.float32) + b1_ref[...]
    o_ref[...] = (jnp.dot(h.astype(w2_ref.dtype), w2_ref[...],
                          preferred_element_type=jnp.float32)
                  + b2_ref[...]).astype(o_ref.dtype)


def _round_up(x, m):
    return ((x + m - 1) // m) * m


def pallas_fused_projection(x, w1, b1, w2, b2, block_m=512):
    """x: (B,N,Cin) -> (B,N,Cout) via (x @ w1 + b1) @ w2 + b2 in one kernel.

    bf16 MXU operands / f32 accumulation; hidden & out dims padded to 128-lane
    multiples in the wrapper (padded weight rows/cols are zero, sliced after).
    """
    B, N, Cin = x.shape
    hidden = w1.shape[1]
    Cout = w2.shape[1]
    hp = _round_up(hidden, 128)
    cp = _round_up(Cout, 128)
    w1p = jnp.zeros((Cin, hp), jnp.bfloat16).at[:, :hidden].set(
        w1.astype(jnp.bfloat16))
    b1p = jnp.zeros((1, hp), jnp.float32).at[:, :hidden].set(
        b1.reshape(1, -1).astype(jnp.float32))
    w2p = jnp.zeros((hp, cp), jnp.bfloat16).at[:hidden, :Cout].set(
        w2.astype(jnp.bfloat16))
    b2p = jnp.zeros((1, cp), jnp.float32).at[:, :Cout].set(
        b2.reshape(1, -1).astype(jnp.float32))

    M = B * N
    tm = M if M <= block_m else block_m
    grid = (pl.cdiv(M, tm),)
    out = pl.pallas_call(
        _fused_proj_kernel,
        out_shape=jax.ShapeDtypeStruct((M, cp), jnp.float32),
        grid=grid,
        in_specs=[pl.BlockSpec((tm, Cin), lambda i: (i, 0)),
                  pl.BlockSpec((Cin, hp), lambda i: (0, 0)),
                  pl.BlockSpec((1, hp), lambda i: (0, 0)),
                  pl.BlockSpec((hp, cp), lambda i: (0, 0)),
                  pl.BlockSpec((1, cp), lambda i: (0, 0))],
        out_specs=pl.BlockSpec((tm, cp), lambda i: (i, 0)),
        compiler_params=pltpu.CompilerParams(dimension_semantics=("parallel",)),
    )(x.reshape(M, Cin).astype(jnp.bfloat16), w1p, b1p, w2p, b2p)
    return out[:, :Cout].reshape(B, N, Cout)


# ----------------------------------------------------------------------------
# GeometricTransformer (Pallas version)
# ----------------------------------------------------------------------------
class GeometricTransformerPallas:
    def __init__(self, input_dim, output_dim, hidden_dim, num_heads, blocks,
                 sigma_d, sigma_a, angle_k, dropout=None, activation_fn="ReLU",
                 reduction_a="max", seed=0):
        if reduction_a not in ("max", "mean"):
            raise ValueError(f"Unsupported reduction mode: {reduction_a}.")
        self.sigma_d = float(sigma_d)
        self.sigma_a = float(sigma_a)
        self.angle_k = angle_k
        self.blocks = blocks
        self.num_heads = num_heads
        # Deterministic parameter init (torch.nn.Linear-style uniform bounds).
        k1, k2, k3, k4 = jax.random.split(jax.random.PRNGKey(seed), 4)
        s_in = 1.0 / np.sqrt(input_dim)
        s_out = 1.0 / np.sqrt(hidden_dim)
        self.in_w = jax.random.uniform(k1, (input_dim, hidden_dim), jnp.float32, -s_in, s_in)
        self.in_b = jax.random.uniform(k2, (hidden_dim,), jnp.float32, -s_in, s_in)
        self.out_w = jax.random.uniform(k3, (hidden_dim, output_dim), jnp.float32, -s_out, s_out)
        self.out_b = jax.random.uniform(k4, (output_dim,), jnp.float32, -s_out, s_out)
        self._ref_embeddings = None
        self._src_embeddings = None

    def __call__(self, ref_points, src_points, ref_feats, src_feats,
                 ref_normals_c, src_normals_c, ref_masks=None, src_masks=None):
        ref_embeddings_list = []
        src_embeddings_list = []
        # Windowed embeddings (win_size 2 and 4).  Like the torch reference,
        # this path assumes batch size 1 (the reference pads with a batch-1
        # zero tensor and views away the batch dim).
        for win_size in (2, 4):
            w2 = win_size * win_size
            for pts, nrm, lst in ((ref_points, ref_normals_c, ref_embeddings_list),
                                  (src_points, src_normals_c, src_embeddings_list)):
                n_pts = pts.shape[1]
                add = (-n_pts) % w2
                p0 = pts[0].astype(jnp.float32)
                n0 = nrm[0].astype(jnp.float32)
                if add:
                    p0 = jnp.concatenate([p0, jnp.zeros((add, 3), jnp.float32)], 0)
                    n0 = jnp.concatenate([n0, jnp.zeros((add, 3), jnp.float32)], 0)
                L = n_pts + add
                lst.append(geometric_structure_embedding_windows(
                    p0.reshape(L // w2, w2, 3),
                    n0.reshape(L // w2, w2, 3),
                    self.sigma_d))
        # Full-resolution embeddings (same append order as the reference).
        src_embeddings_list.append(
            geometric_structure_embedding(src_points, src_normals_c, self.sigma_d))
        ref_embeddings_list.append(
            geometric_structure_embedding(ref_points, ref_normals_c, self.sigma_d))
        # Each list entry is a lane-dense tuple (d/sigma_d, seta, angle_map),
        # i.e. the channels of torch's cat([...], dim=-1) kept unstacked.
        self._ref_embeddings = ref_embeddings_list
        self._src_embeddings = src_embeddings_list

        # TODO(synk): RPEConditionalTransformer is not defined in the provided
        # reference source, so the transformer stage is an identity passthrough;
        # in_proj and out_proj are therefore fused into one pipelined kernel
        # (removes the (B, N, hidden) HBM round trip).
        ref_feats = pallas_fused_projection(ref_feats, self.in_w, self.in_b,
                                            self.out_w, self.out_b)
        src_feats = pallas_fused_projection(src_feats, self.in_w, self.in_b,
                                            self.out_w, self.out_b)
        return ref_feats, src_feats


# ----------------------------------------------------------------------------
if __name__ == "__main__":
    key = jax.random.PRNGKey(0)
    kp1, kp2, kf1, kf2, kn1, kn2 = jax.random.split(key, 6)
    B, N, M, C_in, hidden, C_out = 1, 8, 8, 16, 32, 16

    ref_points = jax.random.normal(kp1, (B, N, 3), jnp.float32)
    src_points = jax.random.normal(kp2, (B, M, 3), jnp.float32)
    ref_feats = jax.random.normal(kf1, (B, N, C_in), jnp.float32)
    src_feats = jax.random.normal(kf2, (B, M, C_in), jnp.float32)
    ref_normals = jax.random.normal(kn1, (B, N, 3), jnp.float32)
    src_normals = jax.random.normal(kn2, (B, M, 3), jnp.float32)

    model = GeometricTransformerPallas(
        input_dim=C_in, output_dim=C_out, hidden_dim=hidden, num_heads=4,
        blocks=["self", "cross"], sigma_d=0.2, sigma_a=15.0, angle_k=3)

    ref_out, src_out = model(ref_points, src_points, ref_feats, src_feats,
                             ref_normals, src_normals)
    jax.block_until_ready((ref_out, src_out,
                           model._ref_embeddings, model._src_embeddings))
    assert ref_out.shape == (B, N, C_out) and src_out.shape == (B, M, C_out)
    print("KERNEL_OK")
</pallas_src>

<mosaic_0001>
module attributes {stable_mosaic.version = 11 : i64} {
  func.func @_geo_embed_window_kernel(%arg0: i32, %arg1: memref<4x2xf32, #tpu.memory_space<vmem>>, %arg2: memref<4x2xf32, #tpu.memory_space<vmem>>, %arg3: memref<4x2xf32, #tpu.memory_space<vmem>>, %arg4: memref<4x2xf32, #tpu.memory_space<vmem>>, %arg5: memref<4x2xf32, #tpu.memory_space<vmem>>, %arg6: memref<4x2xf32, #tpu.memory_space<vmem>>, %arg7: memref<4x4x2xbf16, #tpu.memory_space<vmem>>, %arg8: memref<4x4x2xbf16, #tpu.memory_space<vmem>>, %arg9: memref<4x4x2xbf16, #tpu.memory_space<vmem>>) attributes {dimension_semantics = [#tpu.dimension_semantics<parallel>], iteration_bounds = array<i64: 1>, scalar_prefetch = 0 : i64, scratch_operands = 0 : i64, tpu.core_type = #tpu.core_type<tc>, window_params = [{transform_indices = @transform_0, window_bounds = array<i64: 4, 2>}, {transform_indices = @transform_1, window_bounds = array<i64: 4, 2>}, {transform_indices = @transform_2, window_bounds = array<i64: 4, 2>}, {transform_indices = @transform_3, window_bounds = array<i64: 4, 2>}, {transform_indices = @transform_4, window_bounds = array<i64: 4, 2>}, {transform_indices = @transform_5, window_bounds = array<i64: 4, 2>}, {transform_indices = @transform_6, window_bounds = array<i64: 4, 4, 2>}, {transform_indices = @transform_7, window_bounds = array<i64: 4, 4, 2>}, {transform_indices = @transform_8, window_bounds = array<i64: 4, 4, 2>}]} {
    %c0 = arith.constant 0 : index
    %c0_0 = arith.constant 0 : index
    %0 = vector.load %arg1[%c0, %c0_0] : memref<4x2xf32, #tpu.memory_space<vmem>>, vector<4x2xf32>
    %c0_1 = arith.constant 0 : index
    %c0_2 = arith.constant 0 : index
    %1 = vector.load %arg2[%c0_1, %c0_2] : memref<4x2xf32, #tpu.memory_space<vmem>>, vector<4x2xf32>
    %c0_3 = arith.constant 0 : index
    %c0_4 = arith.constant 0 : index
    %2 = vector.load %arg3[%c0_3, %c0_4] : memref<4x2xf32, #tpu.memory_space<vmem>>, vector<4x2xf32>
    %c0_5 = arith.constant 0 : index
    %c0_6 = arith.constant 0 : index
    %3 = vector.load %arg4[%c0_5, %c0_6] : memref<4x2xf32, #tpu.memory_space<vmem>>, vector<4x2xf32>
    %c0_7 = arith.constant 0 : index
    %c0_8 = arith.constant 0 : index
    %4 = vector.load %arg5[%c0_7, %c0_8] : memref<4x2xf32, #tpu.memory_space<vmem>>, vector<4x2xf32>
    %c0_9 = arith.constant 0 : index
    %c0_10 = arith.constant 0 : index
    %5 = vector.load %arg6[%c0_9, %c0_10] : memref<4x2xf32, #tpu.memory_space<vmem>>, vector<4x2xf32>
    %6 = vector.shape_cast %0 : vector<4x2xf32> to vector<4x1x2xf32>
    %7 = vector.shape_cast %0 : vector<4x2xf32> to vector<1x4x2xf32>
    %8 = vector.broadcast %6 : vector<4x1x2xf32> to vector<4x4x2xf32>
    %9 = vector.broadcast %7 : vector<1x4x2xf32> to vector<4x4x2xf32>
    %10 = arith.mulf %8, %9 : vector<4x4x2xf32>
    %11 = vector.shape_cast %1 : vector<4x2xf32> to vector<4x1x2xf32>
    %12 = vector.shape_cast %1 : vector<4x2xf32> to vector<1x4x2xf32>
    %13 = vector.broadcast %11 : vector<4x1x2xf32> to vector<4x4x2xf32>
    %14 = vector.broadcast %12 : vector<1x4x2xf32> to vector<4x4x2xf32>
    %15 = arith.mulf %13, %14 : vector<4x4x2xf32>
    %16 = arith.addf %10, %15 : vector<4x4x2xf32>
    %17 = vector.shape_cast %2 : vector<4x2xf32> to vector<4x1x2xf32>
    %18 = vector.shape_cast %2 : vector<4x2xf32> to vector<1x4x2xf32>
    %19 = vector.broadcast %17 : vector<4x1x2xf32> to vector<4x4x2xf32>
    %20 = vector.broadcast %18 : vector<1x4x2xf32> to vector<4x4x2xf32>
    %21 = arith.mulf %19, %20 : vector<4x4x2xf32>
    %22 = arith.addf %16, %21 : vector<4x4x2xf32>
    %23 = arith.mulf %0, %0 : vector<4x2xf32>
    %24 = arith.mulf %1, %1 : vector<4x2xf32>
    %25 = arith.addf %23, %24 : vector<4x2xf32>
    %26 = arith.mulf %2, %2 : vector<4x2xf32>
    %27 = arith.addf %25, %26 : vector<4x2xf32>
    %28 = vector.shape_cast %27 : vector<4x2xf32> to vector<4x1x2xf32>
    %29 = vector.shape_cast %27 : vector<4x2xf32> to vector<1x4x2xf32>
    %30 = vector.broadcast %28 : vector<4x1x2xf32> to vector<4x4x2xf32>
    %31 = vector.broadcast %29 : vector<1x4x2xf32> to vector<4x4x2xf32>
    %32 = arith.addf %30, %31 : vector<4x4x2xf32>
    %cst = arith.constant 2.000000e+00 : f32
    %33 = vector.broadcast %cst : f32 to vector<4x4x2xf32>
    %34 = arith.mulf %33, %22 : vector<4x4x2xf32>
    %35 = arith.subf %32, %34 : vector<4x4x2xf32>
    %cst_11 = arith.constant 0.000000e+00 : f32
    %36 = vector.broadcast %cst_11 : f32 to vector<4x4x2xf32>
    %37 = arith.maximumf %35, %36 : vector<4x4x2xf32>
    %38 = math.sqrt %37 : vector<4x4x2xf32>
    %cst_12 = arith.constant 5.000000e+00 : f32
    %39 = vector.broadcast %cst_12 : f32 to vector<4x4x2xf32>
    %40 = arith.mulf %38, %39 : vector<4x4x2xf32>
    %41 = arith.truncf %40 : vector<4x4x2xf32> to vector<4x4x2xbf16>
    %c0_13 = arith.constant 0 : index
    %c0_14 = arith.constant 0 : index
    %c0_15 = arith.constant 0 : index
    %42 = vector.load %arg7[%c0_13, %c0_14, %c0_15] : memref<4x4x2xbf16, #tpu.memory_space<vmem>>, vector<4x4x2xbf16>
    tpu.vector_store %arg7[%c0_13, %c0_14, %c0_15], %41 {strides = array<i32>} : memref<4x4x2xbf16, #tpu.memory_space<vmem>>, vector<4x4x2xbf16>,
    %43 = vector.shape_cast %3 : vector<4x2xf32> to vector<4x1x2xf32>
    %44 = vector.shape_cast %3 : vector<4x2xf32> to vector<1x4x2xf32>
    %45 = vector.broadcast %43 : vector<4x1x2xf32> to vector<4x4x2xf32>
    %46 = vector.broadcast %44 : vector<1x4x2xf32> to vector<4x4x2xf32>
    %47 = arith.mulf %45, %46 : vector<4x4x2xf32>
    %48 = vector.shape_cast %4 : vector<4x2xf32> to vector<4x1x2xf32>
    %49 = vector.shape_cast %4 : vector<4x2xf32> to vector<1x4x2xf32>
    %50 = vector.broadcast %48 : vector<4x1x2xf32> to vector<4x4x2xf32>
    %51 = vector.broadcast %49 : vector<1x4x2xf32> to vector<4x4x2xf32>
    %52 = arith.mulf %50, %51 : vector<4x4x2xf32>
    %53 = arith.addf %47, %52 : vector<4x4x2xf32>
    %54 = vector.shape_cast %5 : vector<4x2xf32> to vector<4x1x2xf32>
    %55 = vector.shape_cast %5 : vector<4x2xf32> to vector<1x4x2xf32>
    %56 = vector.broadcast %54 : vector<4x1x2xf32> to vector<4x4x2xf32>
    %57 = vector.broadcast %55 : vector<1x4x2xf32> to vector<4x4x2xf32>
    %58 = arith.mulf %56, %57 : vector<4x4x2xf32>
    %59 = arith.addf %53, %58 : vector<4x4x2xf32>
    %60 = arith.mulf %3, %3 : vector<4x2xf32>
    %61 = arith.mulf %4, %4 : vector<4x2xf32>
    %62 = arith.addf %60, %61 : vector<4x2xf32>
    %63 = arith.mulf %5, %5 : vector<4x2xf32>
    %64 = arith.addf %62, %63 : vector<4x2xf32>
    %65 = math.sqrt %64 : vector<4x2xf32>
    %cst_16 = arith.constant 1.000000e-30 : f32
    %66 = vector.broadcast %cst_16 : f32 to vector<4x2xf32>
    %67 = arith.maximumf %65, %66 : vector<4x2xf32>
    %68 = tpu.reciprocal %67 {approx = true} : vector<4x2xf32> -> vector<4x2xf32>
    %69 = vector.shape_cast %65 : vector<4x2xf32> to vector<4x1x2xf32>
    %cst_17 = arith.constant 0.000000e+00 : f32
    %70 = vector.broadcast %cst_17 : f32 to vector<4x1x2xf32>
    %71 = arith.cmpf ogt, %69, %70 : vector<4x1x2xf32>
    %72 = vector.shape_cast %65 : vector<4x2xf32> to vector<1x4x2xf32>
    %cst_18 = arith.constant 0.000000e+00 : f32
    %73 = vector.broadcast %cst_18 : f32 to vector<1x4x2xf32>
    %74 = arith.cmpf ogt, %72, %73 : vector<1x4x2xf32>
    %75 = vector.broadcast %71 : vector<4x1x2xi1> to vector<4x4x2xi1>
    %76 = vector.broadcast %74 : vector<1x4x2xi1> to vector<4x4x2xi1>
    %77 = arith.andi %75, %76 : vector<4x4x2xi1>
    %78 = vector.shape_cast %68 : vector<4x2xf32> to vector<4x1x2xf32>
    %79 = vector.broadcast %78 : vector<4x1x2xf32> to vector<4x4x2xf32>
    %80 = arith.mulf %59, %79 : vector<4x4x2xf32>
    %81 = vector.shape_cast %68 : vector<4x2xf32> to vector<1x4x2xf32>
    %82 = vector.broadcast %81 : vector<1x4x2xf32> to vector<4x4x2xf32>
    %83 = arith.mulf %80, %82 : vector<4x4x2xf32>
    %cst_19 = arith.constant 0.000000e+00 : f32
    %84 = vector.broadcast %cst_19 : f32 to vector<4x4x2xf32>
    %85 = arith.select %77, %83, %84 : vector<4x4x2xi1>, vector<4x4x2xf32>
    %cst_20 = arith.constant -1.000000e+00 : f32
    %cst_21 = arith.constant 1.000000e+00 : f32
    %86 = vector.broadcast %cst_20 : f32 to vector<4x4x2xf32>
    %87 = arith.maximumf %86, %85 : vector<4x4x2xf32>
    %88 = vector.broadcast %cst_21 : f32 to vector<4x4x2xf32>
    %89 = arith.minimumf %88, %87 : vector<4x4x2xf32>
    %90 = math.absf %89 : vector<4x4x2xf32>
    %cst_22 = arith.constant -1.872930e-02 : f32
    %91 = vector.broadcast %cst_22 : f32 to vector<4x4x2xf32>
    %92 = arith.mulf %90, %91 : vector<4x4x2xf32>
    %cst_23 = arith.constant 7.426100e-02 : f32
    %93 = vector.broadcast %cst_23 : f32 to vector<4x4x2xf32>
    %94 = arith.addf %93, %92 : vector<4x4x2xf32>
    %95 = arith.mulf %90, %94 : vector<4x4x2xf32>
    %cst_24 = arith.constant -0.212114394 : f32
    %96 = vector.broadcast %cst_24 : f32 to vector<4x4x2xf32>
    %97 = arith.addf %96, %95 : vector<4x4x2xf32>
    %98 = arith.mulf %90, %97 : vector<4x4x2xf32>
    %cst_25 = arith.constant 1.57072878 : f32
    %99 = vector.broadcast %cst_25 : f32 to vector<4x4x2xf32>
    %100 = arith.addf %99, %98 : vector<4x4x2xf32>
    %cst_26 = arith.constant 1.000000e+00 : f32
    %101 = vector.broadcast %cst_26 : f32 to vector<4x4x2xf32>
    %102 = arith.subf %101, %90 : vector<4x4x2xf32>
    %cst_27 = arith.constant 0.000000e+00 : f32
    %103 = vector.broadcast %cst_27 : f32 to vector<4x4x2xf32>
    %104 = arith.maximumf %102, %103 : vector<4x4x2xf32>
    %105 = math.sqrt %104 : vector<4x4x2xf32>
    %106 = arith.mulf %105, %100 : vector<4x4x2xf32>
    %cst_28 = arith.constant 0.000000e+00 : f32
    %107 = vector.broadcast %cst_28 : f32 to vector<4x4x2xf32>
    %108 = arith.cmpf oge, %89, %107 : vector<4x4x2xf32>
    %cst_29 = arith.constant 3.14159274 : f32
    %109 = vector.broadcast %cst_29 : f32 to vector<4x4x2xf32>
    %110 = arith.subf %109, %106 : vector<4x4x2xf32>
    %111 = arith.select %108, %106, %110 : vector<4x4x2xi1>, vector<4x4x2xf32>
    %112 = arith.truncf %111 : vector<4x4x2xf32> to vector<4x4x2xbf16>
    %c0_30 = arith.constant 0 : index
    %c0_31 = arith.constant 0 : index
    %c0_32 = arith.constant 0 : index
    %113 = vector.load %arg8[%c0_30, %c0_31, %c0_32] : memref<4x4x2xbf16, #tpu.memory_space<vmem>>, vector<4x4x2xbf16>
    tpu.vector_store %arg8[%c0_30, %c0_31, %c0_32], %112 {strides = array<i32>} : memref<4x4x2xbf16, #tpu.memory_space<vmem>>, vector<4x4x2xbf16>,
    %cst_33 = arith.constant 9.99999997E-7 : f32
    %114 = vector.broadcast %cst_33 : f32 to vector<4x4x2xf32>
    %115 = arith.addf %38, %114 : vector<4x4x2xf32>
    %116 = tpu.reciprocal %115 {approx = true} : vector<4x4x2xf32> -> vector<4x4x2xf32>
    %117 = vector.shape_cast %3 : vector<4x2xf32> to vector<4x1x2xf32>
    %118 = vector.shape_cast %0 : vector<4x2xf32> to vector<1x4x2xf32>
    %119 = vector.broadcast %117 : vector<4x1x2xf32> to vector<4x4x2xf32>
    %120 = vector.broadcast %118 : vector<1x4x2xf32> to vector<4x4x2xf32>
    %121 = arith.mulf %119, %120 : vector<4x4x2xf32>
    %122 = vector.shape_cast %4 : vector<4x2xf32> to vector<4x1x2xf32>
    %123 = vector.shape_cast %1 : vector<4x2xf32> to vector<1x4x2xf32>
    %124 = vector.broadcast %122 : vector<4x1x2xf32> to vector<4x4x2xf32>
    %125 = vector.broadcast %123 : vector<1x4x2xf32> to vector<4x4x2xf32>
    %126 = arith.mulf %124, %125 : vector<4x4x2xf32>
    %127 = arith.addf %121, %126 : vector<4x4x2xf32>
    %128 = vector.shape_cast %5 : vector<4x2xf32> to vector<4x1x2xf32>
    %129 = vector.shape_cast %2 : vector<4x2xf32> to vector<1x4x2xf32>
    %130 = vector.broadcast %128 : vector<4x1x2xf32> to vector<4x4x2xf32>
    %131 = vector.broadcast %129 : vector<1x4x2xf32> to vector<4x4x2xf32>
    %132 = arith.mulf %130, %131 : vector<4x4x2xf32>
    %133 = arith.addf %127, %132 : vector<4x4x2xf32>
    %134 = vector.shape_cast %0 : vector<4x2xf32> to vector<4x1x2xf32>
    %135 = vector.shape_cast %3 : vector<4x2xf32> to vector<1x4x2xf32>
    %136 = vector.broadcast %134 : vector<4x1x2xf32> to vector<4x4x2xf32>
    %137 = vector.broadcast %135 : vector<1x4x2xf32> to vector<4x4x2xf32>
    %138 = arith.mulf %136, %137 : vector<4x4x2xf32>
    %139 = vector.shape_cast %1 : vector<4x2xf32> to vector<4x1x2xf32>
    %140 = vector.shape_cast %4 : vector<4x2xf32> to vector<1x4x2xf32>
    %141 = vector.broadcast %139 : vector<4x1x2xf32> to vector<4x4x2xf32>
    %142 = vector.broadcast %140 : vector<1x4x2xf32> to vector<4x4x2xf32>
    %143 = arith.mulf %141, %142 : vector<4x4x2xf32>
    %144 = arith.addf %138, %143 : vector<4x4x2xf32>
    %145 = vector.shape_cast %2 : vector<4x2xf32> to vector<4x1x2xf32>
    %146 = vector.shape_cast %5 : vector<4x2xf32> to vector<1x4x2xf32>
    %147 = vector.broadcast %145 : vector<4x1x2xf32> to vector<4x4x2xf32>
    %148 = vector.broadcast %146 : vector<1x4x2xf32> to vector<4x4x2xf32>
    %149 = arith.mulf %147, %148 : vector<4x4x2xf32>
    %150 = arith.addf %144, %149 : vector<4x4x2xf32>
    %151 = arith.mulf %3, %0 : vector<4x2xf32>
    %152 = arith.mulf %4, %1 : vector<4x2xf32>
    %153 = arith.addf %151, %152 : vector<4x2xf32>
    %154 = arith.mulf %5, %2 : vector<4x2xf32>
    %155 = arith.addf %153, %154 : vector<4x2xf32>
    %156 = vector.shape_cast %155 : vector<4x2xf32> to vector<4x1x2xf32>
    %157 = vector.broadcast %156 : vector<4x1x2xf32> to vector<4x4x2xf32>
    %158 = arith.subf %133, %157 : vector<4x4x2xf32>
    %159 = vector.shape_cast %68 : vector<4x2xf32> to vector<4x1x2xf32>
    %160 = vector.broadcast %159 : vector<4x1x2xf32> to vector<4x4x2xf32>
    %161 = arith.mulf %158, %160 : vector<4x4x2xf32>
    %162 = arith.mulf %161, %116 : vector<4x4x2xf32>
    %163 = vector.shape_cast %155 : vector<4x2xf32> to vector<1x4x2xf32>
    %164 = vector.broadcast %163 : vector<1x4x2xf32> to vector<4x4x2xf32>
    %165 = arith.subf %150, %164 : vector<4x4x2xf32>
    %166 = vector.shape_cast %68 : vector<4x2xf32> to vector<1x4x2xf32>
    %167 = vector.broadcast %166 : vector<1x4x2xf32> to vector<4x4x2xf32>
    %168 = arith.mulf %165, %167 : vector<4x4x2xf32>
    %169 = arith.mulf %168, %116 : vector<4x4x2xf32>
    %cst_34 = arith.constant -1.000000e+00 : f32
    %cst_35 = arith.constant 1.000000e+00 : f32
    %170 = vector.broadcast %cst_34 : f32 to vector<4x4x2xf32>
    %171 = arith.maximumf %170, %162 : vector<4x4x2xf32>
    %172 = vector.broadcast %cst_35 : f32 to vector<4x4x2xf32>
    %173 = arith.minimumf %172, %171 : vector<4x4x2xf32>
    %174 = math.absf %173 : vector<4x4x2xf32>
    %cst_36 = arith.constant -1.872930e-02 : f32
    %175 = vector.broadcast %cst_36 : f32 to vector<4x4x2xf32>
    %176 = arith.mulf %174, %175 : vector<4x4x2xf32>
    %cst_37 = arith.constant 7.426100e-02 : f32
    %177 = vector.broadcast %cst_37 : f32 to vector<4x4x2xf32>
    %178 = arith.addf %177, %176 : vector<4x4x2xf32>
    %179 = arith.mulf %174, %178 : vector<4x4x2xf32>
    %cst_38 = arith.constant -0.212114394 : f32
    %180 = vector.broadcast %cst_38 : f32 to vector<4x4x2xf32>
    %181 = arith.addf %180, %179 : vector<4x4x2xf32>
    %182 = arith.mulf %174, %181 : vector<4x4x2xf32>
    %cst_39 = arith.constant 1.57072878 : f32
    %183 = vector.broadcast %cst_39 : f32 to vector<4x4x2xf32>
    %184 = arith.addf %183, %182 : vector<4x4x2xf32>
    %cst_40 = arith.constant 1.000000e+00 : f32
    %185 = vector.broadcast %cst_40 : f32 to vector<4x4x2xf32>
    %186 = arith.subf %185, %174 : vector<4x4x2xf32>
    %cst_41 = arith.constant 0.000000e+00 : f32
    %187 = vector.broadcast %cst_41 : f32 to vector<4x4x2xf32>
    %188 = arith.maximumf %186, %187 : vector<4x4x2xf32>
    %189 = math.sqrt %188 : vector<4x4x2xf32>
    %190 = arith.mulf %189, %184 : vector<4x4x2xf32>
    %cst_42 = arith.constant 0.000000e+00 : f32
    %191 = vector.broadcast %cst_42 : f32 to vector<4x4x2xf32>
    %192 = arith.cmpf oge, %173, %191 : vector<4x4x2xf32>
    %cst_43 = arith.constant 3.14159274 : f32
    %193 = vector.broadcast %cst_43 : f32 to vector<4x4x2xf32>
    %194 = arith.subf %193, %190 : vector<4x4x2xf32>
    %195 = arith.select %192, %190, %194 : vector<4x4x2xi1>, vector<4x4x2xf32>
    %cst_44 = arith.constant -1.000000e+00 : f32
    %cst_45 = arith.constant 1.000000e+00 : f32
    %196 = vector.broadcast %cst_44 : f32 to vector<4x4x2xf32>
    %197 = arith.maximumf %196, %169 : vector<4x4x2xf32>
    %198 = vector.broadcast %cst_45 : f32 to vector<4x4x2xf32>
    %199 = arith.minimumf %198, %197 : vector<4x4x2xf32>
    %200 = math.absf %199 : vector<4x4x2xf32>
    %cst_46 = arith.constant -1.872930e-02 : f32
    %201 = vector.broadcast %cst_46 : f32 to vector<4x4x2xf32>
    %202 = arith.mulf %200, %201 : vector<4x4x2xf32>
    %cst_47 = arith.constant 7.426100e-02 : f32
    %203 = vector.broadcast %cst_47 : f32 to vector<4x4x2xf32>
    %204 = arith.addf %203, %202 : vector<4x4x2xf32>
    %205 = arith.mulf %200, %204 : vector<4x4x2xf32>
    %cst_48 = arith.constant -0.212114394 : f32
    %206 = vector.broadcast %cst_48 : f32 to vector<4x4x2xf32>
    %207 = arith.addf %206, %205 : vector<4x4x2xf32>
    %208 = arith.mulf %200, %207 : vector<4x4x2xf32>
    %cst_49 = arith.constant 1.57072878 : f32
    %209 = vector.broadcast %cst_49 : f32 to vector<4x4x2xf32>
    %210 = arith.addf %209, %208 : vector<4x4x2xf32>
    %cst_50 = arith.constant 1.000000e+00 : f32
    %211 = vector.broadcast %cst_50 : f32 to vector<4x4x2xf32>
    %212 = arith.subf %211, %200 : vector<4x4x2xf32>
    %cst_51 = arith.constant 0.000000e+00 : f32
    %213 = vector.broadcast %cst_51 : f32 to vector<4x4x2xf32>
    %214 = arith.maximumf %212, %213 : vector<4x4x2xf32>
    %215 = math.sqrt %214 : vector<4x4x2xf32>
    %216 = arith.mulf %215, %210 : vector<4x4x2xf32>
    %cst_52 = arith.constant 0.000000e+00 : f32
    %217 = vector.broadcast %cst_52 : f32 to vector<4x4x2xf32>
    %218 = arith.cmpf oge, %199, %217 : vector<4x4x2xf32>
    %cst_53 = arith.constant 3.14159274 : f32
    %219 = vector.broadcast %cst_53 : f32 to vector<4x4x2xf32>
    %220 = arith.subf %219, %216 : vector<4x4x2xf32>
    %221 = arith.select %218, %216, %220 : vector<4x4x2xi1>, vector<4x4x2xf32>
    %222 = arith.subf %195, %221 : vector<4x4x2xf32>
    %223 = math.absf %222 : vector<4x4x2xf32>
    %224 = arith.truncf %223 : vector<4x4x2xf32> to vector<4x4x2xbf16>
    %c0_54 = arith.constant 0 : index
    %c0_55 = arith.constant 0 : index
    %c0_56 = arith.constant 0 : index
    %225 = vector.load %arg9[%c0_54, %c0_55, %c0_56] : memref<4x4x2xbf16, #tpu.memory_space<vmem>>, vector<4x4x2xbf16>
    tpu.vector_store %arg9[%c0_54, %c0_55, %c0_56], %224 {strides = array<i32>} : memref<4x4x2xbf16, #tpu.memory_space<vmem>>, vector<4x4x2xbf16>,
    return
  }
  func.func @transform_0(%arg0: i32) -> (i32, i32) {
    %c0_i32 = arith.constant 0 : i32
    %c0_i32_0 = arith.constant 0 : i32
    return %c0_i32, %arg0 : i32, i32
  }
  func.func @transform_1(%arg0: i32) -> (i32, i32) {
    %c0_i32 = arith.constant 0 : i32
    %c0_i32_0 = arith.constant 0 : i32
    return %c0_i32, %arg0 : i32, i32
  }
  func.func @transform_2(%arg0: i32) -> (i32, i32) {
    %c0_i32 = arith.constant 0 : i32
    %c0_i32_0 = arith.constant 0 : i32
    return %c0_i32, %arg0 : i32, i32
  }
  func.func @transform_3(%arg0: i32) -> (i32, i32) {
    %c0_i32 = arith.constant 0 : i32
    %c0_i32_0 = arith.constant 0 : i32
    return %c0_i32, %arg0 : i32, i32
  }
  func.func @transform_4(%arg0: i32) -> (i32, i32) {
    %c0_i32 = arith.constant 0 : i32
    %c0_i32_0 = arith.constant 0 : i32
    return %c0_i32, %arg0 : i32, i32
  }
  func.func @transform_5(%arg0: i32) -> (i32, i32) {
    %c0_i32 = arith.constant 0 : i32
    %c0_i32_0 = arith.constant 0 : i32
    return %c0_i32, %arg0 : i32, i32
  }
  func.func @transform_6(%arg0: i32) -> (i32, i32, i32) {
    %c0_i32 = arith.constant 0 : i32
    %c0_i32_0 = arith.constant 0 : i32
    %c0_i32_1 = arith.constant 0 : i32
    return %c0_i32, %c0_i32_0, %arg0 : i32, i32, i32
  }
  func.func @transform_7(%arg0: i32) -> (i32, i32, i32) {
    %c0_i32 = arith.constant 0 : i32
    %c0_i32_0 = arith.constant 0 : i32
    %c0_i32_1 = arith.constant 0 : i32
    return %c0_i32, %c0_i32_0, %arg0 : i32, i32, i32
  }
  func.func @transform_8(%arg0: i32) -> (i32, i32, i32) {
    %c0_i32 = arith.constant 0 : i32
    %c0_i32_0 = arith.constant 0 : i32
    %c0_i32_1 = arith.constant 0 : i32
    return %c0_i32, %c0_i32_0, %arg0 : i32, i32, i32
  }
}

</mosaic_0001>

<bundles_post_ra>
// kernel: tpu_custom_call.1
= control target key start
LH: loop header
LB: loop body
LE: loop exit
PB: predicated region body
PF: predicated region fallthrough
CT: control target
= control target key end

     0   :  { %v36_v0 = vlaneseq  ;;  %v1064_v4 = vmov 1966171168   ;;  %vm289_vm4 = vcmask 9216   ;;  %s1862_s0 = inlined_call_operand.vmem [shape: f32[4,2], index: 0, kind: input, shape index: {}]   ;;  %s1863_s1 = inlined_call_operand.vmem [shape: f32[4,2], index: 1, kind: input, shape index: {}]   ;;  %s1864_s2 = inlined_call_operand.vmem [shape: f32[4,2], index: 2, kind: input, shape index: {}]   ;;  %s1865_s3 = inlined_call_operand.vmem [shape: f32[4,2], index: 3, kind: input, shape index: {}]   ;;  %s1866_s4 = inlined_call_operand.vmem [shape: f32[4,2], index: 4, kind: input, shape index: {}]   ;;  %s1867_s5 = inlined_call_operand.vmem [shape: f32[4,2], index: 5, kind: input, shape index: {}]   ;;  %s1868_s6 = inlined_call_operand.vmem [shape: bf16[4,4,2], index: 6, kind: output, shape index: {0}]   ;;  %s1869_s7 = inlined_call_operand.vmem [shape: bf16[4,4,2], index: 7, kind: output, shape index: {1}]   ;;  %s1870_s8 = inlined_call_operand.vmem [shape: bf16[4,4,2], index: 8, kind: output, shape index: {2}]  }
   0x1   :  { %v1114_v1 = vld [vmem:[%s1862_s0] sm:$0xf]  ;;  %v34_v5 = vunpack.c.l.s4 %v1064_v4 }
   0x2   :  { %v1119_v2 = vld [vmem:[%s1863_s1] sm:$0xf]  ;;  %v37_v6 = vshrl.u32 %v36_v0, 7  ;;  %v187_v7 = vmul.f32 %v1114_v1, %v1114_v1 }
   0x3   :  { %v1124_v3 = vld [vmem:[%s1864_s2] sm:$0xf]  ;;  %v188_v8 = vmul.f32 %v1119_v2, %v1119_v2  ;;  %v35_v10 = vunpack.c.0.s8 %v34_v5 }
   0x4   :  { %v190_v9 = vmul.f32 %v1124_v3, %v1124_v3  ;;  %v1137_v13 = vld [vmem:[%s1865_s3] sm:$0xf]  ;;  %v1153_v18 = vsub.s32 0, %v37_v6 }
   0x5   :  { %v189_v11 = vadd.f32 %v188_v8, %v187_v7  ;;  %v1132_v12 = vsub.s32 %v35_v10, %v37_v6  ;;  %v1142_v14 = vld [vmem:[%s1866_s4] sm:$0xf]  ;;  %v449_v22 = vmul.f32 %v1137_v13, %v1137_v13 }
   0x6   :  { %v1147_v15 = vld [vmem:[%s1867_s5] sm:$0xf]  ;;  %v450_v23 = vmul.f32 %v1142_v14, %v1142_v14 }
   0x7   :  { %v1149_v16 = vadd.f32 %v190_v9, %v189_v11  ;;  %v39_v17 = vrot.slane %v1114_v1, %v1132_v12  ;;  %v88_v19 = vrot.slane %v1119_v2, %v1132_v12  ;;  %v141_v20 = vrot.slane %v1124_v3, %v1132_v12 }
   0x8   :  { %v452_v24 = vmul.f32 %v1147_v15, %v1147_v15  ;;  %v451_v48 = vadd.f32 %v450_v23, %v449_v22 }
   0x9   :  { %v199_v21 = vrot.slane %v1149_v16, %v1132_v12  ;;  %v47_v25 = vrot.slane %v39_v17, %v1132_v12  ;;  %v96_v26 = vrot.slane %v88_v19, %v1132_v12  ;;  %v149_v27 = vrot.slane %v141_v20, %v1132_v12 }
   0xa   :  { %v40_v28 = vcombine.high %v39_v17, %v39_v17  ;;  %v89_v30 = vcombine.high %v88_v19, %v88_v19  ;;  %v142_v31 = vcombine.high %v141_v20, %v141_v20 }
   0xb   :  { %v207_v29 = vrot.slane %v199_v21, %v1132_v12  ;;  %v200_v32 = vcombine.high %v199_v21, %v199_v21  ;;  %v1172_v33 = vrot.slane %v47_v25, %v1153_v18  ;;  %v1175_v34 = vrot.slane %v96_v26, %v1153_v18 }
   0xc   :  { %v1178_v35 = vrot.slane %v149_v27, %v1153_v18  ;;  %v54_v36 = vrot.slane %v40_v28, %v1132_v12  ;;  %v103_v38 = vrot.slane %v89_v30, %v1132_v12  ;;  %v156_v39 = vrot.slane %v142_v31, %v1132_v12 }
   0xd   :  { %v220_v37 = vrot.slane %v207_v29, %v1153_v18  ;;  %v214_v40 = vrot.slane %v200_v32, %v1132_v12  ;;  %v77_v41 = vmul.f32 %v1172_v33, %v1114_v1  ;;  %v126_v42 = vmul.f32 %v1175_v34, %v1119_v2 }
   0xe   :  { %v179_v43 = vmul.f32 %v1178_v35, %v1124_v3  ;;  %v1192_v44 = vrot.slane %v54_v36, %v1153_v18  ;;  %v1195_v45 = vrot.slane %v103_v38, %v1153_v18  ;;  %v1198_v46 = vrot.slane %v156_v39, %v1153_v18 }
   0xf   :  { %v224_v47 = vrot.slane %v214_v40, %v1153_v18  ;;  %v130_v49 = vadd.f32 %v126_v42, %v77_v41  ;;  %v55_v51 = vcombine.high %v47_v25, %v47_v25  ;;  %v104_v52 = vcombine.high %v96_v26, %v96_v26 }
  0x10   :  { %v78_v50 = vmul.f32 %v1192_v44, %v1114_v1  ;;  %v237_v53 = vadd.f32 %v220_v37, %v1149_v16  ;;  %v127_v54 = vmul.f32 %v1195_v45, %v1119_v2  ;;  %v180_v55 = vmul.f32 %v1198_v46, %v1124_v3 }
  0x11   :  { %v157_v56 = vcombine.high %v149_v27, %v149_v27  ;;  %v183_v57 = vadd.f32 %v179_v43, %v130_v49  ;;  %v1209_v58 = vrot.slane %v55_v51, %v1153_v18  ;;  %v1212_v59 = vrot.slane %v104_v52, %v1153_v18 }
  0x12   :  { %v215_v60 = vcombine.high %v207_v29, %v207_v29  ;;  %v131_v61 = vadd.f32 %v127_v54, %v78_v50  ;;  %v56_v63 = vcombine.high %v54_v36, %v54_v36  ;;  %v105_v0 = vcombine.high %v103_v38, %v103_v38 }
  0x13   :  { %v1215_v62 = vrot.slane %v157_v56, %v1153_v18  ;;  %v241_v4 = vmul.f32 2.0, %v183_v57  ;;  %v238_v5 = vadd.f32 %v224_v47, %v1149_v16  ;;  %v79_v6 = vmul.f32 %v1209_v58, %v1114_v1 }
  0x14   :  { %v128_v7 = vmul.f32 %v1212_v59, %v1119_v2  ;;  %v184_v8 = vadd.f32 %v180_v55, %v131_v61  ;;  %v1225_v10 = vrot.slane %v56_v63, %v1153_v18  ;;  %v1228_v11 = vrot.slane %v105_v0, %v1153_v18 }
  0x15   :  { %v181_v9 = vmul.f32 %v1215_v62, %v1124_v3  ;;  %v245_v17 = vsub.f32 %v237_v53, %v241_v4  ;;  %v228_v20 = vrot.slane %v215_v60, %v1153_v18  ;;  %v158_v21 = vcombine.high %v156_v39, %v156_v39 }
  0x16   :  { %1878 = vst [vmem:[#allocation2_spill] sm:$0xff] %v1225_v10  ;;  %1879 = vst [vmem:[#allocation3_spill] sm:$0xff] %v1228_v11  ;;  %v132_v19 = vadd.f32 %v128_v7, %v79_v6  ;;  %v242_v22 = vmul.f32 2.0, %v184_v8  ;;  %v80_v23 = vmul.f32 %v1225_v10, %v1114_v1  ;;  %v129_v25 = vmul.f32 %v1228_v11, %v1119_v2 }
  0x17   :  { %v216_v26 = vcombine.high %v214_v40, %v214_v40  ;;  %v1235_v27 = vmax.f32 %v245_v17, 0.0  ;;  %v1238_v29 = vrot.slane %v158_v21, %v1153_v18  ;;  %v1240_v30 = vadd.f32 %v452_v24, %v451_v48 }
  0x18   :  { %v185_v28 = vadd.f32 %v181_v9, %v132_v19  ;;  %v246_v31 = vsub.f32 %v238_v5, %v242_v22  ;;  %v301_v32 = vrot.slane %v1137_v13, %v1132_v12  ;;  %v728_v36 = vmul.f32 %v1137_v13, %v1114_v1 }
  0x19   :  { %1880 = vst [vmem:[#allocation4_spill] sm:$0xff] %v1238_v29  ;;  %v729_v37 = vmul.f32 %v1142_v14, %v1119_v2  ;;  %1020 = vrsqrt.f32 %v1235_v27  ;;  %v239_v38 = vadd.f32 %v228_v20, %v1149_v16  ;;  %v133_v39 = vadd.f32 %v129_v25, %v80_v23 }
  0x1a   :  { %v350_v40 = vrot.slane %v1142_v14, %v1132_v12  ;;  %v1252_v24 = vmax.f32 %v246_v31, 0.0  ;;  %v243_v41 = vmul.f32 2.0, %v185_v28  ;;  %v182_v42 = vmul.f32 %v1238_v29, %v1124_v3 }
  0x1b   :  { %v232_v43 = vrot.slane %v216_v26, %v1153_v18  ;;  %v309_v47 = vrot.slane %v301_v32, %v1132_v12  ;;  %1022 = vrsqrt.f32 %v1240_v30  ;;  %v403_v49 = vrot.slane %v1147_v15, %v1132_v12 }
  0x1c   :  { %v1259_v48 = vrot.slane %v350_v40, %v1132_v12  ;;  %1024 = vrsqrt.f32 %v1252_v24  ;;  %v1267_v50 = vmul.f32 %v1147_v15, %v1124_v3  ;;  %v247_v51 = vsub.f32 %v239_v38, %v243_v41 }
  0x1d   :  { %v186_v52 = vadd.f32 %v182_v42, %v133_v39  ;;  %v1270_v53 = vrot.slane %v309_v47, %v1153_v18  ;;  %vm255_vm0 = vcmp.eq.f32.partialorder %v1235_v27, inf  ;;  %vm257_vm1 = vcmp.eq.f32.partialorder %v1235_v27, 0.0 }
  0x1e   :  { %v1274_v54 = vrot.slane %v1259_v48, %v1153_v18  ;;  %v240_v55 = vadd.f32 %v232_v43, %v1149_v16  ;;  %v1279_v56 = vadd.f32 %v729_v37, %v728_v36  ;;  %v1281_v57 = vmax.f32 %v247_v51, 0.0 }
  0x1f   :  { %v244_v60 = vmul.f32 2.0, %v186_v52  ;;  %v339_v61 = vmul.f32 %v1270_v53, %v1137_v13  ;;  %v258_v0 = vand.u32 2147483648, %v1235_v27  ;;  %vm262_vm2 = vcmp.eq.f32.partialorder %v1252_v24, inf }
  0x20   :  { %v388_v63 = vmul.f32 %v1274_v54, %v1142_v14  ;;  %vm264_vm3 = vcmp.eq.f32.partialorder %v1252_v24, 0.0  ;;  %v411_v4 = vrot.slane %v403_v49, %v1132_v12  ;;  %1026 = vrsqrt.f32 %v1281_v57 }
  0x21   :  { %v302_v16 = vcombine.high %v301_v32, %v301_v32  ;;  %v351_v5 = vcombine.high %v350_v40, %v350_v40  ;;  %v404_v6 = vcombine.high %v403_v49, %v403_v49  ;;  %v265_v7 = vand.u32 2147483648, %v1252_v24 }
  0x22   :  { %v248_v8 = vsub.f32 %v240_v55, %v244_v60  ;;  %v1294_v9 = vrot.slane %v411_v4, %v1153_v18  ;;  %v317_v17 = vcombine.high %v309_v47, %v309_v47  ;;  %v1296_v20 = vadd.f32 %v388_v63, %v339_v61 }
  0x23   :  { %v1021_v19 = vpop.eup %1020  ;;  %vm456_vm5 = vcmp.eq.f32.partialorder %v1240_v30, inf  ;;  %vm458_vm6 = vcmp.eq.f32.partialorder %v1240_v30, 0.0  ;;  %v459_v21 = vand.u32 2147483648, %v1240_v30  ;;  %vm269_vm7 = vcmp.eq.f32.partialorder %v1281_v57, inf }
  0x24   :  { %v254_v22 = vmul.f32 %v1021_v19, %v1235_v27  ;;  %v1303_v23 = vmax.f32 %v248_v8, 0.0  ;;  %v441_v25 = vmul.f32 %v1294_v9, %v1147_v15  ;;  %vm271_vm8 = vcmp.eq.f32.partialorder %v1281_v57, 0.0 }
  0x25   :  { %v1023_v26 = vpop.eup %1022  ;;  %v1309_v28 = vrot.slane %v302_v16, %v1132_v12  ;;  %v1312_v31 = vrot.slane %v351_v5, %v1132_v12  ;;  %v1315_v32 = vrot.slane %v404_v6, %v1132_v12  ;;  %v1322_v38 = vrot.slane %v317_v17, %v1153_v18 }
  0x26   :  { %v1025_v36 = vpop.eup %1024  ;;  %v256_v37 = vsel %vm255_vm0, %v1235_v27, %v254_v22  ;;  %1028 = vrsqrt.f32 %v1303_v23  ;;  %v366_v39 = vcombine.high %v1259_v48, %v1259_v48  ;;  %v455_v42 = vmul.f32 %v1023_v26, %v1240_v30 }
  0x27   :  { %v259_v40 = vsel %vm257_vm1, %v258_v0, %v256_v37  ;;  %v261_v41 = vmul.f32 %v1025_v36, %v1252_v24  ;;  %v419_v43 = vcombine.high %v411_v4, %v411_v4  ;;  %v272_v49 = vand.u32 2147483648, %v1281_v57 }
  0x28   :  { %v281_v47 = vmul.f32 5.0, %v259_v40  ;;  %v1333_v51 = vrot.slane %v1309_v28, %v1153_v18  ;;  %v1337_v52 = vrot.slane %v1312_v31, %v1153_v18  ;;  %v457_v48 = vsel %vm456_vm5, %v1240_v30, %v455_v42 }
  0x29   :  { %v263_v27 = vsel %vm262_vm2, %v1252_v24, %v261_v41  ;;  %v1347_v55 = vrot.slane %v1315_v32, %v1153_v18  ;;  %v341_v60 = vmul.f32 %v1322_v38, %v1137_v13  ;;  %v1357_v0 = vsel %vm458_vm6, %v459_v21, %v457_v48 }
  0x2a   :  { %v285_v61 = vpack.c.bf16 %v281_v47, %v281_v47  ;;  %v1353_v63 = vsel %vm264_vm3, %v265_v7, %v263_v27  ;;  %v1360_v4 = vrot.slane %v366_v39, %v1153_v18  ;;  %v1027_v16 = vpop.eup %1026  ;;  %v461_v6 = vmax.f32 %v1357_v0, 1e-30 }
  0x2b   :  { %v282_v5 = vmul.f32 5.0, %v1353_v63  ;;  %v470_v8 = vrot.slane %v1357_v0, %v1132_v12  ;;  %v1367_v17 = vrot.slane %v419_v43, %v1153_v18  ;;  %v268_v30 = vmul.f32 %v1027_v16, %v1281_v57 }
  0x2c   :  { %290 = vst.msk [vmem:[%s1868_s6] sm:$0x3] %vm289_vm4, %v285_v61  ;;  %vm276_vm9 = vcmp.eq.f32.partialorder %v1303_v23, inf  ;;  %vm278_vm10 = vcmp.eq.f32.partialorder %v1303_v23, 0.0  ;;  %v340_v24 = vmul.f32 %v1333_v51, %v1137_v13  ;;  %v389_v21 = vmul.f32 %v1337_v52, %v1142_v14 }
  0x2d   :  { %v286_v7 = vpack.c.bf16 %v282_v5, %v282_v5  ;;  %v478_v19 = vrot.slane %v470_v8, %v1132_v12  ;;  %v471_v22 = vcombine.high %v470_v8, %v470_v8  ;;  %v270_v26 = vsel %vm269_vm7, %v1281_v57, %v268_v30 }
  0x2e   :  { %v279_v36 = vand.u32 2147483648, %v1303_v23  ;;  %1030 = vrcp.f32 %v461_v6  ;;  %v390_v37 = vmul.f32 %v1360_v4, %v1142_v14  ;;  %v1393_v39 = vsel %vm271_vm8, %v272_v49, %v270_v26 }
  0x2f   :  { %291 = vst.msk [vmem:[%s1868_s6 + $0x2] sm:$0x3] %vm289_vm4, %v286_v7  ;;  %vm492_vm11 = vcmp.gt.f32.partialorder %v478_v19, 0.0  ;;  %v485_v41 = vrot.slane %v471_v22, %v1132_v12  ;;  %v486_v42 = vcombine.high %v478_v19, %v478_v19  ;;  %v680_v47 = vadd.f32 1e-06, %v259_v40 }
  0x30   :  { %v1029_v43 = vpop.eup %1028  ;;  %v283_v27 = vmul.f32 5.0, %v1393_v39  ;;  %v1065_v48 = vmov 0   ;;  %v442_v16 = vmul.f32 %v1347_v55, %v1147_v15  ;;  %v393_v6 = vadd.f32 %v389_v21, %v340_v24 }
  0x31   :  { %v497_v61 = vsel %vm492_vm11, 1, %v1065_v48  ;;  %v275_v5 = vmul.f32 %v1029_v43, %v1303_v23  ;;  %vm493_vm12 = vcmp.gt.f32.partialorder %v485_v41, 0.0  ;;  %vm494_vm13 = vcmp.gt.f32.partialorder %v486_v42, 0.0 }
  0x32   :  { %v287_v57 = vpack.c.bf16 %v283_v27, %v283_v27  ;;  %v445_v49 = vadd.f32 %v441_v25, %v1296_v20  ;;  %v394_v8 = vadd.f32 %v390_v37, %v341_v60  ;;  %v443_v30 = vmul.f32 %v1367_v17, %v1147_v15 }
  0x33   :  { %v277_v40 = vsel %vm276_vm9, %v1303_v23, %v275_v5  ;;  %v504_v7 = vrot.slane %v497_v61, %v1153_v18  ;;  %v498_v19 = vsel %vm493_vm12, 1, %v1065_v48  ;;  %v499_v22 = vsel %vm494_vm13, 1, %v1065_v48 }
  0x34   :  { %292 = vst.msk [vmem:[%s1868_s6 + $0x4] sm:$0x3] %vm289_vm4, %v287_v57  ;;  %v1413_v20 = vsel %vm278_vm10, %v279_v36, %v277_v40  ;;  %v318_v25 = vcombine.high %v1309_v28, %v1309_v28  ;;  %v367_v60 = vcombine.high %v1312_v31, %v1312_v31  ;;  %v420_v24 = vcombine.high %v1315_v32, %v1315_v32 }
  0x35   :  { %1032 = vrcp.f32 %v680_v47  ;;  %v284_v21 = vmul.f32 5.0, %v1413_v20  ;;  %vm496_vm14 = vcmp.gt.f32.partialorder %v1357_v0, 0.0  ;;  %v446_v26 = vadd.f32 %v442_v16, %v393_v6 }
  0x36   :  { %v447_v37 = vadd.f32 %v443_v30, %v394_v8  ;;  %v1424_v23 = vrot.slane %v318_v25, %v1153_v18  ;;  %v1427_v36 = vrot.slane %v367_v60, %v1153_v18  ;;  %v487_v28 = vcombine.high %v485_v41, %v485_v41 }
  0x37   :  { %v288_v42 = vpack.c.bf16 %v284_v21, %v284_v21  ;;  %vm1429_vm15 = vcmp.eq.s32.totalorder %v504_v7, 1  ;;  %v508_v32 = vrot.slane %v498_v19, %v1153_v18  ;;  %v512_v43 = vrot.slane %v499_v22, %v1153_v18 }
  0x38   :  { %v1435_v47 = vpop.eup %1030  ;;  %v342_v27 = vmul.f32 %v1424_v23, %v1137_v13  ;;  %v391_v61 = vmul.f32 %v1427_v36, %v1142_v14  ;;  %v1442_v16 = vrot.slane %v420_v24, %v1153_v18  ;;  %vm495_vm0 = vcmp.gt.f32.partialorder %v487_v28, 0.0  ;;  %vm1499_vm3 = vmand %vm1429_vm15, %vm496_vm14 }
  0x39   :  { %293 = vst.msk [vmem:[%s1868_s6 + $0x6] sm:$0x3] %vm289_vm4, %v288_v42  ;;  %v534_v41 = vrot.slane %v1435_v47, %v1132_v12  ;;  %v500_v5 = vsel %vm495_vm0, 1, %v1065_v48  ;;  %v688_v6 = vmul.f32 %v1270_v53, %v1114_v1  ;;  %v692_v57 = vmul.f32 %v1274_v54, %v1119_v2 }
  0x3a   :  { %v395_v8 = vadd.f32 %v391_v61, %v342_v27  ;;  %v444_v30 = vmul.f32 %v1442_v16, %v1147_v15  ;;  %v708_v40 = vmul.f32 %v1172_v33, %v1137_v13  ;;  %v712_v7 = vmul.f32 %v1175_v34, %v1142_v14 }
  0x3b   :  { %v542_v19 = vrot.slane %v534_v41, %v1132_v12  ;;  %vm1461_vm1 = vcmp.eq.s32.totalorder %v508_v32, 1  ;;  %v535_v53 = vcombine.high %v534_v41, %v534_v41  ;;  %v720_v54 = vmul.f32 %v1178_v35, %v1147_v15 }
  0x3c   :  { %vm1467_vm2 = vcmp.eq.s32.totalorder %v512_v43, 1  ;;  %v516_v25 = vrot.slane %v500_v5, %v1153_v18  ;;  %v716_v33 = vadd.f32 %v712_v7, %v708_v40  ;;  %v1474_v34 = vadd.f32 %v1267_v50, %v1279_v56  ;;  %vm1519_vm6 = vmand %vm1461_vm1, %vm496_vm14 }
  0x3d   :  { %v1477_v60 = vrot.slane %v542_v19, %v1153_v18  ;;  %v549_v24 = vrot.slane %v535_v53, %v1132_v12  ;;  %v550_v21 = vcombine.high %v542_v19, %v542_v19  ;;  %v696_v28 = vadd.f32 %v692_v57, %v688_v6  ;;  %vm1533_vm7 = vmand %vm1467_vm2, %vm496_vm14 }
  0x3e   :  { %v448_v42 = vadd.f32 %v444_v30, %v395_v8  ;;  %v700_v35 = vmul.f32 %v1294_v9, %v1124_v3  ;;  %v724_v32 = vadd.f32 %v720_v54, %v716_v33  ;;  %v1484_v43 = vrot.slane %v1474_v34, %v1132_v12 }
  0x3f   :  { %v1486_v27 = vpop.eup %1032  ;;  %v572_v50 = vmul.f32 %v1477_v60, %v445_v49  ;;  %v1490_v56 = vrot.slane %v549_v24, %v1153_v18  ;;  %v1493_v61 = vrot.slane %v550_v21, %v1153_v18  ;;  %v551_v41 = vcombine.high %v549_v24, %v549_v24 }
  0x40   :  { %vm1503_vm5 = vcmp.eq.s32.totalorder %v516_v25, 1  ;;  %v1509_v49 = vrot.slane %v1484_v43, %v1132_v12  ;;  %v790_v6 = vsub.f32 %v724_v32, %v1474_v34  ;;  %v709_v57 = vmul.f32 %v1192_v44, %v1137_v13 }
  0x41   :  { %v576_v8 = vmul.f32 %v1435_v47, %v572_v50  ;;  %v573_v30 = vmul.f32 %v1490_v56, %v446_v26  ;;  %v574_v40 = vmul.f32 %v1493_v61, %v447_v37  ;;  %v1526_v7 = vrot.slane %v551_v41, %v1153_v18  ;;  %vm1552_vm8 = vmand %vm1503_vm5, %vm496_vm14 }
  0x42   :  { %v681_v19 = vadd.f32 1e-06, %v1353_v63  ;;  %v704_v48 = vadd.f32 %v700_v35, %v696_v28  ;;  %v761_v53 = vrot.slane %v1509_v49, %v1153_v18  ;;  %v713_v26 = vmul.f32 %v1195_v45, %v1142_v14 }
  0x43   :  { %1893 = vst [vmem:[#allocation5_spill] sm:$0xff] %v1526_v7  ;;  %v580_v37 = vsel %vm1499_vm3, %v576_v8, 0.0  ;;  %v577_v63 = vmul.f32 %v1435_v47, %v573_v30  ;;  %v578_v54 = vmul.f32 %v1435_v47, %v574_v40  ;;  %v575_v22 = vmul.f32 %v1526_v7, %v448_v42 }
  0x44   :  { %v1546_v25 = vclamps-f32 %v580_v37, 1.0  ;;  %v794_v45 = vmul.f32 %v1435_v47, %v790_v6  ;;  %v717_v24 = vadd.f32 %v713_v26, %v709_v57  ;;  %v721_v0 = vmul.f32 %v1198_v46, %v1147_v15 }
  0x45   :  { %v581_v21 = vsel %vm1519_vm6, %v577_v63, 0.0  ;;  %v582_v28 = vsel %vm1533_vm7, %v578_v54, 0.0  ;;  %v579_v42 = vmul.f32 %v1435_v47, %v575_v22  ;;  %1034 = vrcp.f32 %v681_v19 }
  0x46   :  { %v592_v35 = vand.u32 2147483647, %v1546_v25  ;;  %v1565_v32 = vclamps-f32 %v581_v21, 1.0  ;;  %v1567_v50 = vclamps-f32 %v582_v28, 1.0  ;;  %v778_v9 = vsub.f32 %v704_v48, %v761_v53 }
  0x47   :  { %v583_v41 = vsel %vm1552_vm8, %v579_v42, 0.0  ;;  %v689_v5 = vmul.f32 %v1333_v51, %v1114_v1  ;;  %v1573_v6 = vadd.f32 %v721_v0, %v717_v24  ;;  %v693_v31 = vmul.f32 %v1337_v52, %v1119_v2 }
  0x48   :  { %v596_v57 = vmul.f32 -0.0187293, %v592_v35  ;;  %v620_v8 = vsub.f32 1.0, %v592_v35  ;;  %v593_v46 = vand.u32 2147483647, %v1565_v32  ;;  %v1580_v19 = vclamps-f32 %v583_v41, 1.0 }
  0x49   :  { %v682_v30 = vadd.f32 1e-06, %v1393_v39  ;;  %v594_v40 = vand.u32 2147483647, %v1567_v50  ;;  %v1583_v44 = vmul.f32 %v1486_v27, %v794_v45  ;;  %v782_v52 = vmul.f32 %v778_v9, %v1477_v60 }
  0x4a   :  { %v600_v48 = vadd.f32 0.074261, %v596_v57  ;;  %v1585_v51 = vmax.f32 %v620_v8, 0.0  ;;  %v597_v53 = vmul.f32 -0.0187293, %v593_v46  ;;  %v621_v26 = vsub.f32 1.0, %v593_v46 }
  0x4b   :  { %v598_v37 = vmul.f32 -0.0187293, %v594_v40  ;;  %v622_v63 = vsub.f32 1.0, %v594_v40  ;;  %v595_v54 = vand.u32 2147483647, %v1580_v19  ;;  %v697_v39 = vadd.f32 %v693_v31, %v689_v5 }
  0x4c   :  { %v604_v22 = vmul.f32 %v600_v48, %v592_v35  ;;  %1036 = vrsqrt.f32 %v1585_v51  ;;  %v701_v33 = vmul.f32 %v1347_v55, %v1124_v3  ;;  %v601_v45 = vadd.f32 0.074261, %v597_v53 }
  0x4d   :  { %1038 = vrcp.f32 %v682_v30  ;;  %v1592_v24 = vmax.f32 %v621_v26, 0.0  ;;  %v602_v21 = vadd.f32 0.074261, %v598_v37  ;;  %v1594_v42 = vmax.f32 %v622_v63, 0.0 }
  0x4e   :  { %v608_v28 = vadd.f32 -0.2121144, %v604_v22  ;;  %v599_v0 = vmul.f32 -0.0187293, %v595_v54  ;;  %v1872_v41 = vclamps-f32 %v1583_v44, 1.0  ;;  %v605_v57 = vmul.f32 %v601_v45, %v593_v46 }
  0x4f   :  { %1040 = vrsqrt.f32 %v1592_v24  ;;  %v623_v60 = vsub.f32 1.0, %v595_v54  ;;  %v1599_v9 = vmul.f32 %v1486_v27, %v782_v52  ;;  %v1601_v5 = vpop.eup %1034  ;;  %vm630_vm9 = vcmp.eq.f32.partialorder %v1585_v51, inf }
  0x50   :  { %v606_v55 = vmul.f32 %v602_v21, %v594_v40  ;;  %1042 = vrsqrt.f32 %v1594_v42  ;;  %v1605_v8 = vadd.f32 %v701_v33, %v697_v39  ;;  %vm632_vm10 = vcmp.eq.f32.partialorder %v1585_v51, 0.0 }
  0x51   :  { %v633_v31 = vand.u32 2147483648, %v1585_v51  ;;  %v609_v30 = vadd.f32 -0.2121144, %v605_v57  ;;  %vm637_vm11 = vcmp.eq.f32.partialorder %v1592_v24, inf  ;;  %v612_v48 = vmul.f32 %v608_v28, %v592_v35 }
  0x52   :  { %v610_v53 = vadd.f32 -0.2121144, %v606_v55  ;;  %v603_v27 = vadd.f32 0.074261, %v599_v0  ;;  %v741_v26 = vcombine.high %v1484_v43, %v1484_v43  ;;  %v1612_v63 = vmax.f32 %v623_v60, 0.0 }
  0x53   :  { %v613_v37 = vmul.f32 %v609_v30, %v593_v46  ;;  %v1871_v52 = vclamps-f32 %v1599_v9, 1.0  ;;  %v1617_v22 = vand.u32 2147483647, %v1872_v41  ;;  %vm660_vm12 = vcmp.ge.f32.partialorder %v1546_v25, 0.0 }
  0x54   :  { %vm639_vm13 = vcmp.eq.f32.partialorder %v1592_v24, 0.0  ;;  %v640_v35 = vand.u32 2147483648, %v1592_v24  ;;  %v614_v39 = vmul.f32 %v610_v53, %v594_v40  ;;  %v607_v33 = vmul.f32 %v603_v27, %v595_v54 }
  0x55   :  { %vm644_vm14 = vcmp.eq.f32.partialorder %v1594_v42, inf  ;;  %vm646_vm15 = vcmp.eq.f32.partialorder %v1594_v42, 0.0  ;;  %v647_v43 = vand.u32 2147483648, %v1594_v42  ;;  %1044 = vrsqrt.f32 %v1612_v63 }
  0x56   :  { %v1037_v46 = vpop.eup %1036  ;;  %v616_v45 = vadd.f32 1.5707288, %v612_v48  ;;  %v617_v21 = vadd.f32 1.5707288, %v613_v37  ;;  %v611_v28 = vadd.f32 -0.2121144, %v607_v33  ;;  %v1627_v0 = vrot.slane %v741_v26, %v1132_v12 }
  0x57   :  { %v1629_v57 = vpop.eup %1038  ;;  %v629_v40 = vmul.f32 %v1037_v46, %v1585_v51  ;;  %vm661_vm0 = vcmp.ge.f32.partialorder %v1565_v32, 0.0  ;;  %vm651_vm1 = vcmp.eq.f32.partialorder %v1612_v63, inf  ;;  %v810_v60 = vand.u32 2147483647, %v1871_v52 }
  0x58   :  { %1898 = vst [vmem:[#allocation6_spill] sm:$0xff] %v1627_v0  ;;  %v902_v55 = vmul.f32 -0.0187293, %v1617_v22  ;;  %v926_v30 = vsub.f32 1.0, %v1617_v22  ;;  %v618_v48 = vadd.f32 1.5707288, %v614_v39  ;;  %v615_v12 = vmul.f32 %v611_v28, %v595_v54 }
  0x59   :  { %vm662_vm2 = vcmp.ge.f32.partialorder %v1567_v50, 0.0  ;;  %vm653_vm3 = vcmp.eq.f32.partialorder %v1612_v63, 0.0  ;;  %v654_v53 = vand.u32 2147483648, %v1612_v63  ;;  %v765_v27 = vrot.slane %v1627_v0, %v1153_v18  ;;  %v1041_v26 = vpop.eup %1040 }
  0x5a   :  { %v631_v37 = vsel %vm630_vm9, %v1585_v51, %v629_v40  ;;  %v814_v33 = vmul.f32 -0.0187293, %v810_v60  ;;  %v838_v46 = vsub.f32 1.0, %v810_v60  ;;  %v906_v52 = vadd.f32 0.074261, %v902_v55  ;;  %v1043_v41 = vpop.eup %1042 }
  0x5b   :  { %v634_v39 = vsel %vm632_vm10, %v633_v31, %v631_v37  ;;  %v636_v54 = vmul.f32 %v1041_v26, %v1592_v24  ;;  %v1649_v28 = vmax.f32 %v926_v30, 0.0  ;;  %v791_v7 = vsub.f32 %v1573_v6, %v1474_v34 }
  0x5c   :  { %v656_v29 = vmul.f32 %v634_v39, %v616_v45  ;;  %v643_v0 = vmul.f32 %v1043_v41, %v1594_v42  ;;  %v818_v11 = vadd.f32 0.074261, %v814_v33  ;;  %v1654_v10 = vmax.f32 %v838_v46, 0.0 }
  0x5d   :  { %v638_v40 = vsel %vm637_vm11, %v1592_v24, %v636_v54  ;;  %v910_v51 = vmul.f32 %v906_v52, %v1617_v22  ;;  %1046 = vrsqrt.f32 %v1649_v28  ;;  %v690_v31 = vmul.f32 %v1322_v38, %v1114_v1 }
  0x5e   :  { %v664_v55 = vsub.f32 3.1415927, %v656_v29  ;;  %v641_v6 = vsel %vm639_vm13, %v640_v35, %v638_v40  ;;  %v645_v41 = vsel %vm644_vm14, %v1594_v42, %v643_v0  ;;  %vm663_vm5 = vcmp.ge.f32.partialorder %v1580_v19, 0.0 }
  0x5f   :  { %v822_v45 = vmul.f32 %v818_v11, %v810_v60  ;;  %v657_v30 = vmul.f32 %v641_v6, %v617_v21  ;;  %v648_v52 = vsel %vm646_vm15, %v647_v43, %v645_v41  ;;  %v619_v26 = vadd.f32 1.5707288, %v615_v12  ;;  %v1045_v37 = vpop.eup %1044 }
  0x60   :  { %1048 = vrsqrt.f32 %v1654_v10  ;;  %v668_v38 = vsel %vm660_vm12, %v656_v29, %v664_v55  ;;  %v658_v24 = vmul.f32 %v648_v52, %v618_v48  ;;  %vm936_vm6 = vcmp.eq.f32.partialorder %v1649_v28, inf }
  0x61   :  { %v826_v35 = vadd.f32 -0.2121144, %v822_v45  ;;  %v672_v33 = vpack.c.bf16 %v668_v38, %v668_v38  ;;  %v665_v0 = vsub.f32 3.1415927, %v657_v30  ;;  %v650_v46 = vmul.f32 %v1045_v37, %v1612_v63 }
  0x62   :  { %vm848_vm7 = vcmp.eq.f32.partialorder %v1654_v10, inf  ;;  %v666_v11 = vsub.f32 3.1415927, %v658_v24  ;;  %vm850_vm8 = vcmp.eq.f32.partialorder %v1654_v10, 0.0  ;;  %v851_v43 = vand.u32 2147483648, %v1654_v10 }
  0x63   :  { %v830_v42 = vmul.f32 %v826_v35, %v810_v60  ;;  %v914_v21 = vadd.f32 -0.2121144, %v910_v51  ;;  %676 = vst.msk [vmem:[%s1869_s7] sm:$0x3] %vm289_vm4, %v672_v33  ;;  %v669_v29 = vsel %vm661_vm0, %v657_v30, %v665_v0  ;;  %v652_v25 = vsel %vm651_vm1, %v1612_v63, %v650_v46 }
  0x64   :  { %vm938_vm9 = vcmp.eq.f32.partialorder %v1649_v28, 0.0  ;;  %v779_v60 = vsub.f32 %v1605_v8, %v765_v27  ;;  %v673_v48 = vpack.c.bf16 %v669_v29, %v669_v29  ;;  %v670_v12 = vsel %vm662_vm2, %v658_v24, %v666_v11 }
  0x65   :  { %v655_v39 = vsel %vm653_vm3, %v654_v53, %v652_v25  ;;  %v939_v54 = vand.u32 2147483648, %v1649_v28  ;;  %v674_v40 = vpack.c.bf16 %v670_v12, %v670_v12  ;;  %v918_v51 = vmul.f32 %v914_v21, %v1617_v22 }
  0x66   :  { %v659_v32 = vmul.f32 %v655_v39, %v619_v26  ;;  %v1899_v55 = vclamps-f32 %v1583_v44, 1.0  ;;  %v783_v8 = vmul.f32 %v779_v60, %v1490_v56  ;;  %677 = vst.msk [vmem:[%s1869_s7 + $0x2] sm:$0x3] %vm289_vm4, %v673_v48  ;;  %v834_v50 = vadd.f32 1.5707288, %v830_v42 }
  0x67   :  { %v795_v63 = vmul.f32 %v1435_v47, %v791_v7  ;;  %v694_v53 = vmul.f32 %v1360_v4, %v1119_v2  ;;  %v710_v44 = vmul.f32 %v1209_v58, %v1137_v13  ;;  %v1047_v22 = vpop.eup %1046  ;;  %678 = vst.msk [vmem:[%s1869_s7 + $0x4] sm:$0x3] %vm289_vm4, %v674_v40  ;;  %v702_v41 = vmul.f32 %v1367_v17, %v1124_v3 }
  0x68   :  { %vm1698_vm10 = vcmp.ge.f32.partialorder %v1899_v55, 0.0  ;;  %v667_v56 = vsub.f32 3.1415927, %v659_v32  ;;  %v1717_v27 = vmul.f32 %v1601_v5, %v783_v8  ;;  %v714_v7 = vmul.f32 %v1212_v59, %v1142_v14 }
  0x69   :  { %v922_v4 = vadd.f32 1.5707288, %v918_v51  ;;  %v935_v45 = vmul.f32 %v1047_v22, %v1649_v28  ;;  %v1725_v58 = vmul.f32 %v1601_v5, %v795_v63  ;;  %v698_v30 = vadd.f32 %v694_v53, %v690_v31 }
  0x6a   :  { %v1049_v52 = vpop.eup %1048  ;;  %v671_v26 = vsel %vm663_vm5, %v659_v32, %v667_v56  ;;  %v1011_v37 = vclamps-f32 %v1717_v27, 1.0  ;;  %v718_v38 = vadd.f32 %v714_v7, %v710_v44  ;;  %v722_v17 = vmul.f32 %v1215_v62, %v1147_v15 }
  0x6b   :  { %v675_v24 = vpack.c.bf16 %v671_v26, %v671_v26  ;;  %v847_v59 = vmul.f32 %v1049_v52, %v1654_v10  ;;  %v937_v35 = vsel %vm936_vm6, %v1649_v28, %v935_v45  ;;  %v1015_v5 = vclamps-f32 %v1725_v58, 1.0 }
  0x6c   :  { %v1902_v31 = vclamps-f32 %v1599_v9, 1.0  ;;  %v940_v33 = vsel %vm938_vm9, %v939_v54, %v937_v35  ;;  %v811_v0 = vand.u32 2147483647, %v1011_v37  ;;  %v756_v62 = vcombine.high %v1509_v49, %v1509_v49 }
  0x6d   :  { %679 = vst.msk [vmem:[%s1869_s7 + $0x6] sm:$0x3] %vm289_vm4, %v675_v24  ;;  %v849_v9 = vsel %vm848_vm7, %v1654_v10, %v847_v59  ;;  %v962_v46 = vmul.f32 %v940_v33, %v922_v4  ;;  %v899_v11 = vand.u32 2147483647, %v1015_v5  ;;  %v706_v42 = vadd.f32 %v702_v41, %v698_v30  ;;  %v1908_v24 = vld [vmem:[#allocation3_spill] sm:$0xff] }
  0x6e   :  { %vm1739_vm11 = vcmp.ge.f32.partialorder %v1902_v31, 0.0  ;;  %v852_v28 = vsel %vm850_vm8, %v851_v43, %v849_v9  ;;  %v815_v21 = vmul.f32 -0.0187293, %v811_v0  ;;  %v839_v29 = vsub.f32 1.0, %v811_v0 }
  0x6f   :  { %v726_v49 = vadd.f32 %v722_v17, %v718_v38  ;;  %v874_v25 = vmul.f32 %v852_v28, %v834_v50  ;;  %v970_v60 = vsub.f32 3.1415927, %v962_v46  ;;  %v903_v48 = vmul.f32 -0.0187293, %v899_v11 }
  0x70   :  { %v927_v12 = vsub.f32 1.0, %v899_v11  ;;  %v819_v39 = vadd.f32 0.074261, %v815_v21  ;;  %v1758_v54 = vmax.f32 %v839_v29, 0.0  ;;  %v769_v40 = vrot.slane %v756_v62, %v1153_v18 }
  0x71   :  { %v792_v32 = vsub.f32 %v726_v49, %v1474_v34  ;;  %v882_v51 = vsub.f32 3.1415927, %v874_v25  ;;  %v974_v55 = vsel %vm1698_vm10, %v962_v46, %v970_v60  ;;  %v907_v10 = vadd.f32 0.074261, %v903_v48 }
  0x72   :  { %v1764_v43 = vmax.f32 %v927_v12, 0.0  ;;  %v683_v8 = vadd.f32 1e-06, %v1413_v20  ;;  %v823_v50 = vmul.f32 %v819_v39, %v811_v0  ;;  %1050 = vrsqrt.f32 %v1758_v54 }
  0x73   :  { %v886_v63 = vsel %vm1739_vm11, %v874_v25, %v882_v51  ;;  %v911_v53 = vmul.f32 %v907_v10, %v899_v11  ;;  %v780_v27 = vsub.f32 %v706_v42, %v769_v40  ;;  %v796_v6 = vmul.f32 %v1435_v47, %v792_v32  ;;  %v1910_v42 = vld [vmem:[#allocation4_spill] sm:$0xff]  ;;  %v1911_v51 = vld [vmem:[#allocation5_spill] sm:$0xff] }
  0x74   :  { %1052 = vrsqrt.f32 %v1764_v43  ;;  %v978_v44 = vsub.f32 %v886_v63, %v974_v55  ;;  %v827_v22 = vadd.f32 -0.2121144, %v823_v50  ;;  %v691_v20 = vmul.f32 %v1424_v23, %v1114_v1 }
  0x75   :  { %v915_v56 = vadd.f32 -0.2121144, %v911_v53  ;;  %1054 = vrcp.f32 %v683_v8  ;;  %v695_v7 = vmul.f32 %v1427_v36, %v1119_v2  ;;  %vm855_vm12 = vcmp.eq.f32.partialorder %v1758_v54, inf }
  0x76   :  { %v982_v41 = vand.u32 2147483647, %v978_v44  ;;  %v784_v4 = vmul.f32 %v780_v27, %v1493_v61  ;;  %v1779_v45 = vmul.f32 %v1629_v57, %v796_v6  ;;  %v703_v30 = vmul.f32 %v1442_v16, %v1124_v3  ;;  %v1907_v16 = vld [vmem:[#allocation2_spill] sm:$0xff] }
  0x77   :  { %v831_v26 = vmul.f32 %v827_v22, %v811_v0  ;;  %v919_v38 = vmul.f32 %v915_v56, %v899_v11  ;;  %v699_v17 = vadd.f32 %v695_v7, %v691_v20  ;;  %vm857_vm13 = vcmp.eq.f32.partialorder %v1758_v54, 0.0 }
  0x78   :  { %v986_v52 = vpack.c.bf16 %v982_v41, %v982_v41  ;;  %v858_v1 = vand.u32 2147483648, %v1758_v54  ;;  %v1786_v2 = vmul.f32 %v1629_v57, %v784_v4  ;;  %v1016_v23 = vclamps-f32 %v1779_v45, 1.0  ;;  %v1909_v57 = vld [vmem:[#allocation6_spill] sm:$0xff] }
  0x79   :  { %vm1793_vm14 = vcmp.ge.f32.partialorder %v1011_v37, 0.0  ;;  %v707_v36 = vadd.f32 %v703_v30, %v699_v17  ;;  %v711_v61 = vmul.f32 %v1907_v16, %v1137_v13  ;;  %v715_v59 = vmul.f32 %v1908_v24, %v1142_v14 }
  0x7a   :  { %990 = vst.msk [vmem:[%s1870_s8] sm:$0x3] %vm289_vm4, %v986_v52  ;;  %v757_v35 = vcombine.high %v1909_v57, %v1909_v57  ;;  %vm943_vm15 = vcmp.eq.f32.partialorder %v1764_v43, inf  ;;  %vm945_vm0 = vcmp.eq.f32.partialorder %v1764_v43, 0.0  ;;  %v1012_v31 = vclamps-f32 %v1786_v2, 1.0 }
  0x7b   :  { %v900_v37 = vand.u32 2147483647, %v1016_v23  ;;  %v835_v33 = vadd.f32 1.5707288, %v831_v26  ;;  %v923_v0 = vadd.f32 1.5707288, %v919_v38  ;;  %v723_v28 = vmul.f32 %v1910_v42, %v1147_v15 }
  0x7c   :  { %v1051_v19 = vpop.eup %1050  ;;  %v946_v13 = vand.u32 2147483648, %v1764_v43  ;;  %v773_v62 = vrot.slane %v757_v35, %v1153_v18  ;;  %v812_v46 = vand.u32 2147483647, %v1012_v31  ;;  %v719_v49 = vadd.f32 %v715_v59, %v711_v61 }
  0x7d   :  { %v854_v9 = vmul.f32 %v1051_v19, %v1758_v54  ;;  %v904_v11 = vmul.f32 -0.0187293, %v900_v37  ;;  %v928_v29 = vsub.f32 1.0, %v900_v37  ;;  %vm967_vm1 = vcmp.ge.f32.partialorder %v1015_v5, 0.0 }
  0x7e   :  { %v1053_v14 = vpop.eup %1052  ;;  %v781_v25 = vsub.f32 %v707_v36, %v773_v62  ;;  %v816_v18 = vmul.f32 -0.0187293, %v812_v46  ;;  %v840_v48 = vsub.f32 1.0, %v812_v46  ;;  %v727_v22 = vadd.f32 %v723_v28, %v719_v49 }
  0x7f   :  { %v942_v21 = vmul.f32 %v1053_v14, %v1764_v43  ;;  %v856_v60 = vsel %vm855_vm12, %v1758_v54, %v854_v9  ;;  %v908_v12 = vadd.f32 0.074261, %v904_v11  ;;  %v1055_v39 = vpop.eup %1054  ;;  %v932_v32 = vmax.f32 %v928_v29, 0.0 }
  0x80   :  { %v859_v40 = vsel %vm857_vm13, %v858_v1, %v856_v60  ;;  %v785_v55 = vmul.f32 %v781_v25, %v1911_v51  ;;  %v820_v50 = vadd.f32 0.074261, %v816_v18  ;;  %v844_v63 = vmax.f32 %v840_v48, 0.0 }
  0x81   :  { %v944_v15 = vsel %vm943_vm15, %v1764_v43, %v942_v21  ;;  %v875_v10 = vmul.f32 %v859_v40, %v835_v33  ;;  %v912_v44 = vmul.f32 %v908_v12, %v900_v37  ;;  %1056 = vrsqrt.f32 %v932_v32 }
  0x82   :  { %v947_v8 = vsel %vm945_vm0, %v946_v13, %v944_v15  ;;  %v824_v54 = vmul.f32 %v820_v50, %v812_v46  ;;  %1058 = vrsqrt.f32 %v844_v63  ;;  %v1831_v7 = vmul.f32 %v1055_v39, %v785_v55 }
  0x83   :  { %v963_v53 = vmul.f32 %v947_v8, %v923_v0  ;;  %v883_v56 = vsub.f32 3.1415927, %v875_v10  ;;  %v916_v41 = vadd.f32 -0.2121144, %v912_v44  ;;  %v793_v4 = vsub.f32 %v727_v22, %v1474_v34 }
  0x84   :  { %v828_v43 = vadd.f32 -0.2121144, %v824_v54  ;;  %v1013_v26 = vclamps-f32 %v1831_v7, 1.0  ;;  %vm862_vm2 = vcmp.eq.f32.partialorder %v844_v63, inf  ;;  %vm864_vm3 = vcmp.eq.f32.partialorder %v844_v63, 0.0 }
  0x85   :  { %v971_v27 = vsub.f32 3.1415927, %v963_v53  ;;  %v887_v6 = vsel %vm1793_vm14, %v875_v10, %v883_v56  ;;  %v797_v52 = vmul.f32 %v1435_v47, %v793_v4  ;;  %v920_v5 = vmul.f32 %v916_v41, %v900_v37 }
  0x86   :  { %v832_v38 = vmul.f32 %v828_v43, %v812_v46  ;;  %v813_v1 = vand.u32 2147483647, %v1013_v26  ;;  %vm950_vm5 = vcmp.eq.f32.partialorder %v932_v32, inf  ;;  %v953_v16 = vand.u32 2147483648, %v932_v32 }
  0x87   :  { %v975_v20 = vsel %vm967_vm1, %v963_v53, %v971_v27  ;;  %v1836_v17 = vmul.f32 %v1055_v39, %v797_v52  ;;  %v865_v59 = vand.u32 2147483648, %v844_v63  ;;  %v924_v57 = vadd.f32 1.5707288, %v920_v5 }
  0x88   :  { %v979_v30 = vsub.f32 %v887_v6, %v975_v20  ;;  %v817_v34 = vmul.f32 -0.0187293, %v813_v1  ;;  %v841_v61 = vsub.f32 1.0, %v813_v1  ;;  %vm952_vm6 = vcmp.eq.f32.partialorder %v932_v32, 0.0 }
  0x89   :  { %v1017_v47 = vclamps-f32 %v1836_v17, 1.0  ;;  %v836_v37 = vadd.f32 1.5707288, %v832_v38  ;;  %vm968_vm7 = vcmp.ge.f32.partialorder %v1016_v23, 0.0  ;;  %vm880_vm8 = vcmp.ge.f32.partialorder %v1012_v31, 0.0 }
  0x8a   :  { %v983_v58 = vand.u32 2147483647, %v979_v30  ;;  %v821_v33 = vadd.f32 0.074261, %v817_v34  ;;  %v845_v0 = vmax.f32 %v841_v61, 0.0  ;;  %vm881_vm13 = vcmp.ge.f32.partialorder %v1013_v26, 0.0 }
  0x8b   :  { %v1057_v36 = vpop.eup %1056  ;;  %v901_v62 = vand.u32 2147483647, %v1017_v47  ;;  %vm969_vm14 = vcmp.ge.f32.partialorder %v1017_v47, 0.0 }
  0x8c   :  { %v987_v3 = vpack.c.bf16 %v983_v58, %v983_v58  ;;  %v1059_v24 = vpop.eup %1058  ;;  %v949_v35 = vmul.f32 %v1057_v36, %v932_v32  ;;  %v825_v46 = vmul.f32 %v821_v33, %v813_v1  ;;  %1060 = vrsqrt.f32 %v845_v0 }
  0x8d   :  { %v861_v19 = vmul.f32 %v1059_v24, %v844_v63  ;;  %v905_v21 = vmul.f32 -0.0187293, %v901_v62  ;;  %v929_v49 = vsub.f32 1.0, %v901_v62  ;;  %vm869_vm9 = vcmp.eq.f32.partialorder %v845_v0, inf }
  0x8e   :  { %991 = vst.msk [vmem:[%s1870_s8 + $0x2] sm:$0x3] %vm289_vm4, %v987_v3  ;;  %v951_v13 = vsel %vm950_vm5, %v932_v32, %v949_v35  ;;  %v829_v60 = vadd.f32 -0.2121144, %v825_v46  ;;  %v872_v45 = vand.u32 2147483648, %v845_v0  ;;  %vm871_vm10 = vcmp.eq.f32.partialorder %v845_v0, 0.0 }
  0x8f   :  { %v863_v14 = vsel %vm862_vm2, %v844_v63, %v861_v19  ;;  %v954_v9 = vsel %vm952_vm6, %v953_v16, %v951_v13  ;;  %v909_v18 = vadd.f32 0.074261, %v905_v21  ;;  %v933_v12 = vmax.f32 %v929_v49, 0.0 }
  0x90   :  { %v866_v11 = vsel %vm864_vm3, %v865_v59, %v863_v14  ;;  %v964_v42 = vmul.f32 %v954_v9, %v924_v57  ;;  %v833_v32 = vmul.f32 %v829_v60, %v813_v1 }
  0x91   :  { %v876_v28 = vmul.f32 %v866_v11, %v836_v37  ;;  %v913_v40 = vmul.f32 %v909_v18, %v901_v62  ;;  %1062 = vrsqrt.f32 %v933_v12  ;;  %vm957_vm11 = vcmp.eq.f32.partialorder %v933_v12, inf }
  0x92   :  { %v972_v29 = vsub.f32 3.1415927, %v964_v42  ;;  %v837_v31 = vadd.f32 1.5707288, %v833_v32  ;;  %v960_v22 = vand.u32 2147483648, %v933_v12  ;;  %vm959_vm12 = vcmp.eq.f32.partialorder %v933_v12, 0.0 }
  0x93   :  { %v884_v25 = vsub.f32 3.1415927, %v876_v28  ;;  %v917_v23 = vadd.f32 -0.2121144, %v913_v40 }
  0x94   :  { %v976_v48 = vsel %vm968_vm7, %v964_v42, %v972_v29 }
  0x95   :  { %v888_v39 = vsel %vm880_vm8, %v876_v28, %v884_v25  ;;  %v921_v63 = vmul.f32 %v917_v23, %v901_v62 }
  0x96   :  { %v980_v15 = vsub.f32 %v888_v39, %v976_v48  ;;  %v1061_v55 = vpop.eup %1060 }
  0x97   :  { %v868_v2 = vmul.f32 %v1061_v55, %v845_v0  ;;  %v925_v56 = vadd.f32 1.5707288, %v921_v63 }
  0x98   :  { %v984_v51 = vand.u32 2147483647, %v980_v15 }
  0x99   :  { %v870_v8 = vsel %vm869_vm9, %v845_v0, %v868_v2 }
  0x9a   :  { %v988_v10 = vpack.c.bf16 %v984_v51, %v984_v51  ;;  %v873_v50 = vsel %vm871_vm10, %v872_v45, %v870_v8 }
  0x9b   :  { %v877_v53 = vmul.f32 %v873_v50, %v837_v31  ;;  %v1063_v44 = vpop.eup %1062 }
  0x9c   :  { %992 = vst.msk [vmem:[%s1870_s8 + $0x4] sm:$0x3] %vm289_vm4, %v988_v10  ;;  %v956_v54 = vmul.f32 %v1063_v44, %v933_v12 }
  0x9d   :  { %v885_v27 = vsub.f32 3.1415927, %v877_v53 }
  0x9e   :  { %v958_v6 = vsel %vm957_vm11, %v933_v12, %v956_v54 }
  0x9f   :  { %v961_v41 = vsel %vm959_vm12, %v960_v22, %v958_v6  ;;  %v889_v43 = vsel %vm881_vm13, %v877_v53, %v885_v27 }
  0xa0   :  { %v965_v20 = vmul.f32 %v961_v41, %v925_v56 }
  0xa2   :  { %v973_v4 = vsub.f32 3.1415927, %v965_v20 }
  0xa4   :  { %v977_v30 = vsel %vm969_vm14, %v965_v20, %v973_v4 }
  0xa5   :  { %v981_v52 = vsub.f32 %v889_v43, %v977_v30 }
  0xa7   :  { %v985_v58 = vand.u32 2147483647, %v981_v52 }
  0xa9   :  { %v989_v5 = vpack.c.bf16 %v985_v58, %v985_v58 }
  0xab   :  { %993 = vst.msk [vmem:[%s1870_s8 + $0x6] sm:$0x3] %vm289_vm4, %v989_v5 }

</bundles_post_ra>
